<compile_context>
chip_gen: v7x
topology: tpu7x:2x2x1
jax: 0.10.0
libtpu: 0.0.40
codegen_flags: <defaults>
</compile_context>

<pallas_src>
import functools

import jax
import jax.numpy as jnp
from jax.experimental import pallas as pl
from jax.experimental.pallas import tpu as pltpu


# ---------------------------------------------------------------------------
# Fused two-layer GCN kernel.
#   Per grid step i (a row strip of the output):
#     H      = relu(A_hat @ (X @ W1) + b1)          (all rows, f32)
#     Y_strip = A_hat[strip] @ (H @ W2) + b2        (this strip only)
# ---------------------------------------------------------------------------
def _gcn2_kernel(a_ref, x_ref, w1_ref, b1_ref, w2_ref, b2_ref, o_ref, *, tm):
    # ---- layer 1 (full rows; tiny, recomputed per row tile) -----------------
    xw1 = jnp.dot(x_ref[...], w1_ref[...], preferred_element_type=jnp.float32)
    h = jnp.dot(a_ref[...], xw1, preferred_element_type=jnp.float32)
    h = jnp.maximum(h + b1_ref[0:1, :], 0.0)

    # ---- layer 2 (only this grid step's output row strip) -------------------
    row0 = pl.multiple_of(pl.program_id(0) * tm, tm)
    a_strip = a_ref[pl.ds(row0, tm), :]
    hw2 = jnp.dot(h, w2_ref[...], preferred_element_type=jnp.float32)
    y = jnp.dot(a_strip, hw2, preferred_element_type=jnp.float32)
    o_ref[...] = (y + b2_ref[0:1, :]).astype(o_ref.dtype)


# ---------------------------------------------------------------------------
# Wrapper: pad to lane-dense / tile-aligned shapes, run the fused kernel.
# ---------------------------------------------------------------------------
def _round_up(x, m):
    return (x + m - 1) // m * m


def _pad2(a, rows, cols):
    return jnp.pad(a, ((0, rows - a.shape[0]), (0, cols - a.shape[1])))


def gcn_forward(a_hat, x, w1, b1, w2, b2, *, tm=128):
    n, f = x.shape
    hid = w1.shape[1]
    emb = w2.shape[1]

    n_pad = _round_up(n, tm)
    f_pad = _round_up(f, 128)
    h_pad = _round_up(hid, 128)
    e_pad = _round_up(emb, 128)

    # This fused path keeps the whole problem resident in VMEM; guard it.
    resident_bytes = 4 * (n_pad * n_pad + n_pad * f_pad + f_pad * h_pad
                          + h_pad * e_pad + 2 * n_pad * max(h_pad, e_pad))
    assert resident_bytes < 24 * 1024 * 1024, (
        "graph too large for the fused resident kernel; use a tiled / "
        "block-sparse aggregation path instead")

    # Zero padding is exact: padded rows/cols of A_hat are zero, so padded H
    # rows never contribute to real output rows, and padded feature columns of
    # W/b stay zero through both layers.
    a_p = _pad2(a_hat.astype(jnp.float32), n_pad, n_pad)
    x_p = _pad2(x.astype(jnp.float32), n_pad, f_pad)
    w1_p = _pad2(w1.astype(jnp.float32), f_pad, h_pad)
    b1_p = _pad2(b1.astype(jnp.float32), 8, h_pad)
    w2_p = _pad2(w2.astype(jnp.float32), h_pad, e_pad)
    b2_p = _pad2(b2.astype(jnp.float32), 8, e_pad)

    kernel = functools.partial(_gcn2_kernel, tm=tm)
    y = pl.pallas_call(
        kernel,
        out_shape=jax.ShapeDtypeStruct((n_pad, e_pad), jnp.float32),
        grid=(n_pad // tm,),
        in_specs=[
            pl.BlockSpec((n_pad, n_pad), lambda i: (0, 0)),   # A_hat (resident)
            pl.BlockSpec((n_pad, f_pad), lambda i: (0, 0)),   # X     (resident)
            pl.BlockSpec((f_pad, h_pad), lambda i: (0, 0)),   # W1
            pl.BlockSpec((8, h_pad), lambda i: (0, 0)),       # b1
            pl.BlockSpec((h_pad, e_pad), lambda i: (0, 0)),   # W2
            pl.BlockSpec((8, e_pad), lambda i: (0, 0)),       # b2
        ],
        out_specs=pl.BlockSpec((tm, e_pad), lambda i: (i, 0)),
        compiler_params=pltpu.CompilerParams(
            dimension_semantics=("parallel",),
            vmem_limit_bytes=32 * 1024 * 1024,
        ),
    )(a_p, x_p, w1_p, b1_p, w2_p, b2_p)

    return y[:n, :emb]


# ---------------------------------------------------------------------------
# Glue: edge_index -> symmetrically-normalized dense adjacency (PyG GCNConv
# default: add_self_loops=True, normalize=True). Duplicate edges accumulate
# weight like PyG's scatter-add.
# ---------------------------------------------------------------------------
def build_normalized_adjacency(edge_index, num_nodes):
    row, col = edge_index[0], edge_index[1]               # src, dst
    loops = jnp.arange(num_nodes, dtype=edge_index.dtype)
    row = jnp.concatenate([row, loops])
    col = jnp.concatenate([col, loops])
    a = jnp.zeros((num_nodes, num_nodes), jnp.float32).at[col, row].add(1.0)
    deg = a.sum(axis=1)
    dinv = jnp.where(deg > 0, jax.lax.rsqrt(deg), 0.0)
    return dinv[:, None] * a * dinv[None, :]


# Pure-JAX f32 reference mirroring the module semantics.
def gcn_ref_f32(a_hat, x, w1, b1, w2, b2):
    h = jnp.maximum(a_hat @ (x @ w1) + b1, 0.0)
    return a_hat @ (h @ w2) + b2


if __name__ == "__main__":
    key = jax.random.PRNGKey(0)
    k_x, k_e, k_w1, k_b1, k_w2, k_b2 = jax.random.split(key, 6)

    num_nodes = 256            # -> 2 output row tiles with tm=128 (v7x: 2 TCs)
    num_node_features = 16
    hidden_layers = 32
    embedding_size = 16
    num_edges = 1024

    x = jax.random.normal(k_x, (num_nodes, num_node_features), jnp.float32)
    edge_index = jax.random.randint(k_e, (2, num_edges), 0, num_nodes,
                                    dtype=jnp.int32)

    def glorot(k, shape):
        fan_in, fan_out = shape
        lim = jnp.sqrt(6.0 / (fan_in + fan_out))
        return jax.random.uniform(k, shape, jnp.float32, -lim, lim)

    w1 = glorot(k_w1, (num_node_features, hidden_layers))
    b1 = 0.1 * jax.random.normal(k_b1, (1, hidden_layers), jnp.float32)
    w2 = glorot(k_w2, (hidden_layers, embedding_size))
    b2 = 0.1 * jax.random.normal(k_b2, (1, embedding_size), jnp.float32)

    a_hat = build_normalized_adjacency(edge_index, num_nodes)

    out = gcn_forward(a_hat, x, w1, b1, w2, b2)
    out = jax.block_until_ready(out)
    assert out.shape == (num_nodes, embedding_size)

    # Full-f32 path end to end -> tight check against the f32 reference.
    ref = gcn_ref_f32(a_hat, x, w1, b1, w2, b2)
    assert jnp.allclose(out, ref, atol=1e-2, rtol=1e-2), (
        float(jnp.max(jnp.abs(out - ref))))

    print("KERNEL_OK")
</pallas_src>

<mosaic_0001>
module attributes {stable_mosaic.version = 11 : i64} {
  func.func @_gcn2_kernel(%arg0: i32, %arg1: memref<256x256xf32, #tpu.memory_space<vmem>>, %arg2: memref<256x128xf32, #tpu.memory_space<vmem>>, %arg3: memref<128x128xf32, #tpu.memory_space<vmem>>, %arg4: memref<8x128xf32, #tpu.memory_space<vmem>>, %arg5: memref<128x128xf32, #tpu.memory_space<vmem>>, %arg6: memref<8x128xf32, #tpu.memory_space<vmem>>, %arg7: memref<128x128xf32, #tpu.memory_space<vmem>>) attributes {dimension_semantics = [#tpu.dimension_semantics<parallel>], iteration_bounds = array<i64: 2>, scalar_prefetch = 0 : i64, scratch_operands = 0 : i64, tpu.core_type = #tpu.core_type<tc>, window_params = [{pipeline_mode = #tpu.pipeline_mode<synchronous>, transform_indices = @transform_0, window_bounds = array<i64: 256, 256>}, {pipeline_mode = #tpu.pipeline_mode<synchronous>, transform_indices = @transform_1, window_bounds = array<i64: 256, 128>}, {pipeline_mode = #tpu.pipeline_mode<synchronous>, transform_indices = @transform_2, window_bounds = array<i64: 128, 128>}, {pipeline_mode = #tpu.pipeline_mode<synchronous>, transform_indices = @transform_3, window_bounds = array<i64: 8, 128>}, {pipeline_mode = #tpu.pipeline_mode<synchronous>, transform_indices = @transform_4, window_bounds = array<i64: 128, 128>}, {pipeline_mode = #tpu.pipeline_mode<synchronous>, transform_indices = @transform_5, window_bounds = array<i64: 8, 128>}, {transform_indices = @transform_6, window_bounds = array<i64: 128, 128>}]} {
    %c0 = arith.constant 0 : index
    %c0_0 = arith.constant 0 : index
    %0 = vector.load %arg2[%c0, %c0_0] : memref<256x128xf32, #tpu.memory_space<vmem>>, vector<256x128xf32>
    %c0_1 = arith.constant 0 : index
    %c0_2 = arith.constant 0 : index
    %1 = vector.load %arg3[%c0_1, %c0_2] : memref<128x128xf32, #tpu.memory_space<vmem>>, vector<128x128xf32>
    %cst = arith.constant dense<0.000000e+00> : vector<256x128xf32>
    %2 = tpu.matmul %0, %1, %cst {dimension_numbers = #tpu.dot_dimension_numbers<[1], [0], [0], [1], [0, 0, 1, 1], [], []>} : vector<256x128xf32>, vector<128x128xf32>, vector<256x128xf32> -> vector<256x128xf32>
    %c0_3 = arith.constant 0 : index
    %c0_4 = arith.constant 0 : index
    %3 = vector.load %arg1[%c0_3, %c0_4] : memref<256x256xf32, #tpu.memory_space<vmem>>, vector<256x256xf32>
    %cst_5 = arith.constant dense<0.000000e+00> : vector<256x128xf32>
    %4 = tpu.matmul %3, %2, %cst_5 {dimension_numbers = #tpu.dot_dimension_numbers<[1], [0], [0], [1], [0, 0, 1, 1], [], []>} : vector<256x256xf32>, vector<256x128xf32>, vector<256x128xf32> -> vector<256x128xf32>
    %c0_6 = arith.constant 0 : index
    %c0_7 = arith.constant 0 : index
    %5 = vector.load %arg4[%c0_6, %c0_7] : memref<8x128xf32, #tpu.memory_space<vmem>>, vector<1x128xf32>
    %6 = vector.broadcast %5 : vector<1x128xf32> to vector<256x128xf32>
    %7 = arith.addf %4, %6 : vector<256x128xf32>
    %cst_8 = arith.constant 0.000000e+00 : f32
    %8 = vector.broadcast %cst_8 : f32 to vector<256x128xf32>
    %9 = arith.maximumf %7, %8 : vector<256x128xf32>
    %c128_i32 = arith.constant 128 : i32
    %10 = arith.muli %arg0, %c128_i32 : i32
    %11 = tpu.assume_multiple %10, 128 : i32
    %12 = arith.index_cast %11 : i32 to index
    %c0_9 = arith.constant 0 : index
    %13 = vector.load %arg1[%12, %c0_9] : memref<256x256xf32, #tpu.memory_space<vmem>>, vector<128x256xf32>
    %c0_10 = arith.constant 0 : index
    %c0_11 = arith.constant 0 : index
    %14 = vector.load %arg5[%c0_10, %c0_11] : memref<128x128xf32, #tpu.memory_space<vmem>>, vector<128x128xf32>
    %cst_12 = arith.constant dense<0.000000e+00> : vector<256x128xf32>
    %15 = tpu.matmul %9, %14, %cst_12 {dimension_numbers = #tpu.dot_dimension_numbers<[1], [0], [0], [1], [0, 0, 1, 1], [], []>} : vector<256x128xf32>, vector<128x128xf32>, vector<256x128xf32> -> vector<256x128xf32>
    %cst_13 = arith.constant dense<0.000000e+00> : vector<128x128xf32>
    %16 = tpu.matmul %13, %15, %cst_13 {dimension_numbers = #tpu.dot_dimension_numbers<[1], [0], [0], [1], [0, 0, 1, 1], [], []>} : vector<128x256xf32>, vector<256x128xf32>, vector<128x128xf32> -> vector<128x128xf32>
    %c0_14 = arith.constant 0 : index
    %c0_15 = arith.constant 0 : index
    %17 = vector.load %arg6[%c0_14, %c0_15] : memref<8x128xf32, #tpu.memory_space<vmem>>, vector<1x128xf32>
    %18 = vector.broadcast %17 : vector<1x128xf32> to vector<128x128xf32>
    %19 = arith.addf %16, %18 : vector<128x128xf32>
    %c0_16 = arith.constant 0 : index
    %c0_17 = arith.constant 0 : index
    %20 = vector.load %arg7[%c0_16, %c0_17] : memref<128x128xf32, #tpu.memory_space<vmem>>, vector<128x128xf32>
    tpu.vector_store %arg7[%c0_16, %c0_17], %19 {strides = array<i32>} : memref<128x128xf32, #tpu.memory_space<vmem>>, vector<128x128xf32>,
    return
  }
  func.func @transform_0(%arg0: i32) -> (i32, i32) {
    %c0_i32 = arith.constant 0 : i32
    %c0_i32_0 = arith.constant 0 : i32
    %c0_i32_1 = arith.constant 0 : i32
    return %c0_i32, %c0_i32_0 : i32, i32
  }
  func.func @transform_1(%arg0: i32) -> (i32, i32) {
    %c0_i32 = arith.constant 0 : i32
    %c0_i32_0 = arith.constant 0 : i32
    %c0_i32_1 = arith.constant 0 : i32
    return %c0_i32, %c0_i32_0 : i32, i32
  }
  func.func @transform_2(%arg0: i32) -> (i32, i32) {
    %c0_i32 = arith.constant 0 : i32
    %c0_i32_0 = arith.constant 0 : i32
    %c0_i32_1 = arith.constant 0 : i32
    return %c0_i32, %c0_i32_0 : i32, i32
  }
  func.func @transform_3(%arg0: i32) -> (i32, i32) {
    %c0_i32 = arith.constant 0 : i32
    %c0_i32_0 = arith.constant 0 : i32
    %c0_i32_1 = arith.constant 0 : i32
    return %c0_i32, %c0_i32_0 : i32, i32
  }
  func.func @transform_4(%arg0: i32) -> (i32, i32) {
    %c0_i32 = arith.constant 0 : i32
    %c0_i32_0 = arith.constant 0 : i32
    %c0_i32_1 = arith.constant 0 : i32
    return %c0_i32, %c0_i32_0 : i32, i32
  }
  func.func @transform_5(%arg0: i32) -> (i32, i32) {
    %c0_i32 = arith.constant 0 : i32
    %c0_i32_0 = arith.constant 0 : i32
    %c0_i32_1 = arith.constant 0 : i32
    return %c0_i32, %c0_i32_0 : i32, i32
  }
  func.func @transform_6(%arg0: i32) -> (i32, i32) {
    %c0_i32 = arith.constant 0 : i32
    %c0_i32_0 = arith.constant 0 : i32
    return %arg0, %c0_i32 : i32, i32
  }
}

</mosaic_0001>

<bundles_post_ra>
// kernel: tpu_custom_call.1
= control target key start
LH: loop header
LB: loop body
LE: loop exit
PB: predicated region body
PF: predicated region fallthrough
CT: control target
= control target key end

     0   :  { %s2641_s0 = inlined_call_operand.hbm [shape: f32[256,256], index: 0, kind: input, shape index: {}]   ;;  %s2642_s1 = inlined_call_operand.hbm [shape: f32[256,128], index: 1, kind: input, shape index: {}]   ;;  %s2643_s2 = inlined_call_operand.hbm [shape: f32[128,128], index: 2, kind: input, shape index: {}]   ;;  %s2644_s3 = inlined_call_operand.vmem [shape: f32[8,128], index: 3, kind: input, shape index: {}]   ;;  %s2645_s4 = inlined_call_operand.hbm [shape: f32[128,128], index: 4, kind: input, shape index: {}]   ;;  %s2646_s5 = inlined_call_operand.vmem [shape: f32[8,128], index: 5, kind: input, shape index: {}]   ;;  %s2647_s6 = inlined_call_operand.hbm [shape: f32[256,128], index: 6, kind: output, shape index: {}]  }
   0x1   :  { %2655 = sst [smem:[#allocation16_spill]] %s2642_s1 }
   0x2   :  { %11 = vsyncpa [#allocation3], 0 }
   0x3   :  { %12 = vsyncpa [#allocation6], 0 }
   0x4   :  { %13 = vsyncpa [#allocation9], 0 }
   0x5   :  { %14 = vsyncpa [#allocation4], 0 }
   0x6   :  { %16 = vsyncpa [#allocation4 + $0x1], 0  ;;  %s2283_s21 = smov 0   ;;  %s2285_s22 = smov 0  }
   0x7   :  { %s2287_s23 = smov 0   ;;  %s2289_s24 = smov 0  }
   0x8 LB: > { %s2304_s25 = sadd.s32 4294967295, %s2234_s24   ;;  %s1441_s26 = sadd.s32 4294967294, %s2234_s24   ;;  %s2234_s24 = sphi %s2289_s24, %s2678_s24   ;;  %s2230_s23 = sphi %s2287_s23, %s2677_s23   ;;  %s2226_s22 = sphi %s2285_s22, %s2676_s22   ;;  %s2222_s21 = sphi %s2283_s21, %s2675_s21  }
   0x9   : > { %s2308_s27 = sadd.s32 1, %s2234_s24   ;;  %s155_s28 = sadd.s32 1, %s2230_s23 }
   0xa   : > { %s152_s29 = ssub.s32 %s2234_s24, %s2308_s27  ;;  %p165_p0 = scmp.ne.s32.totalorder %s2230_s23, %s2226_s22 }
   0xb   : > { %p153_p1 = scmp.eq.s32.totalorder %s152_s29, 0  ;;  %p166_p2 = scmp.eq.s32.totalorder %s2304_s25, 1 }
   0xc   : > { %p171_p3 = scmp.ne.s32.totalorder %s2226_s22, %s2222_s21  ;;  %p172_p4 = scmp.eq.s32.totalorder %s1441_s26, 1 }
   0xd   : > { %s2319_s30 = scalar_select %p153_p1, %s2230_s23, %s155_s28  }
   0xe   : > { %p2321_p5 = por %p166_p2, %p165_p0  ;;  %p2325_p6 = por %p172_p4, %p171_p3 }
   0xf   : > { %2656 = sst [smem:[#allocation15_spill]] %s2319_s30  ;;  %p1442_p7 = scmp.ge.s32.totalorder %s2234_s24, 1 }
  0x10   : > { %s2657_s7 = scalar_select %p2321_p5, 1, 0 }
  0x11   : > { %s2658_s8 = scalar_select %p2325_p6, 1, 0 }
  0x12   : > { %p179_p8 = scmp.lt.s32.totalorder %s2234_s24, 3  ;;  %p2648_p9 = scmp.eq.s32.totalorder %s2304_s25, 0 }
  0x13   : > { %s2236_s10 = smov [#allocation5]   ;;  %s2237_s13 = smov [#allocation2]  }
  0x14   : > { %p2332_p10 = pnand %p1442_p7, %p179_p8  ;;  %s204_s11 = sshll.u32 %s2236_s10, 4  ;;  %s205_s11 = int_to_ptr.vmem [resolvable:$true] %s204_s11 }
  0x15   : > { %s191_s14 = sshll.u32 %s2237_s13, 4  ;;  %s2661_s1 = sld [smem:[#allocation16_spill]]  ;;  %s2344_s14 = int_to_ptr.vmem [resolvable:$true] %s191_s14 }
  0x16   : > { %s2659_s9 = scalar_select %p2332_p10, 1, 0 }
  0x17   : > { %p1979_p11 = pneg %p2332_p10 }
  0x19   : > { %p2340_p12 = pnand %p2648_p9, %p1979_p11 }
  0x1b   : > { %s2048_s17 = scalar_lea.hbm %s2661_s1, 4096  ;;  %p2354_p0 = pneg %p2340_p12 }
  0x1c   : > { %p2049_p13 = scmp.ne.s32.totalorder %s2661_s1, %s2048_s17  ;;  %p2055_p3 = scmp.lt.u32.totalorder %s2048_s17, %s2661_s1 }
  0x1e   : > { %p2051_p1 = pnand %p2354_p0, %p2049_p13 }
  0x20   : > { %p2052_p2 = pneg %p2051_p1 }
  0x22   : > { %p2057_p4 = pnand %p2055_p3, %p2052_p2 }
  0x24   : > { %2060 = shalt.err (!%p2057_p4)
}
  0x25   : > { %s2061_s29 = scalar_lea.vmem %s205_s11, 4096  ;;  %p2069_p9 = scmp.lt.s32.totalorder %s205_s11, %s205_s11 }
  0x26   : > { %p2062_p7 = scmp.ne.s32.totalorder %s205_s11, %s2061_s29  ;;  %p2070_p6 = scmp.lt.s32.totalorder %s2061_s29, %s2061_s29 }
  0x28   : > { %p2064_p8 = pnand %p2062_p7, %p2354_p0  ;;  %p2071_p5 = por %p2070_p6, %p2069_p9 }
  0x2a   : > { %p2065_p11 = pneg %p2064_p8 }
  0x2c   : > { %p2072_p10 = pnand %p2071_p5, %p2065_p11 }
  0x2e   : > { %2075 = shalt.err (!%p2072_p10)
}
  0x2f   : > { %s2651_s10 = smov 128   ;;  %s2653_s13 = smov 8  }
  0x30   : > { %1985 = dma.hbm_to_vmem [thread:$0]  (!%p2340_p12), %s2661_s1, 4096, %s205_s11, [#allocation6], %s2651_s10, %s2651_s10, %s2653_s13  }
  0x31   : > { %s2076_s19 = scalar_lea.hbm %s2641_s0, 8192 }
  0x32   : > { %p2077_p5 = scmp.ne.s32.totalorder %s2641_s0, %s2076_s19  ;;  %p2083_p10 = scmp.lt.u32.totalorder %s2076_s19, %s2641_s0 }
  0x34   : > { %p2079_p6 = pnand %p2077_p5, %p2354_p0 }
  0x36   : > { %p2080_p9 = pneg %p2079_p6 }
  0x38   : > { %p2085_p13 = pnand %p2083_p10, %p2080_p9 }
  0x3a   : > { %2088 = shalt.err (!%p2085_p13)
}
  0x3b   : > { %s2089_s11 = scalar_lea.vmem %s2344_s14, 8192  ;;  %p2097_p4 = scmp.lt.s32.totalorder %s2344_s14, %s2344_s14 }
  0x3c   : > { %p2090_p1 = scmp.ne.s32.totalorder %s2344_s14, %s2089_s11  ;;  %p2098_p7 = scmp.lt.s32.totalorder %s2089_s11, %s2089_s11 }
  0x3e   : > { %p2092_p2 = pnand %p2090_p1, %p2354_p0  ;;  %p2099_p8 = por %p2098_p7, %p2097_p4 }
  0x40   : > { %p2093_p3 = pneg %p2092_p2 }
  0x42   : > { %p2100_p11 = pnand %p2099_p8, %p2093_p3 }
  0x44   : > { %2103 = shalt.err (!%p2100_p11)
}
  0x45   : > { %s2240_s15 = smov 256   ;;  %s2241_s30 = smov 16  }
  0x46   : > { %1982 = dma.hbm_to_vmem [thread:$0]  (!%p2340_p12), %s2641_s0, 8192, %s2344_s14, [#allocation3], %s2240_s15, %s2240_s15, %s2241_s30  }
  0x47   : > { %s2242_s18 = smov [#allocation7]   ;;  %s2243_s26 = smov [#allocation8]  }
  0x48   : > { %s217_s19 = sshll.u32 %s2242_s18, 4  ;;  %s233_s28 = sshll.u32 %s2243_s26, 4  ;;  %s218_s19 = int_to_ptr.vmem [resolvable:$true] %s217_s19  ;;  %s2396_s28 = int_to_ptr.vmem [resolvable:$true] %s233_s28 }
  0x49   : > { %s2104_s10 = scalar_lea.hbm %s2643_s2, 2048 }
  0x4a   : > { %p2105_p5 = scmp.ne.s32.totalorder %s2643_s2, %s2104_s10  ;;  %p2111_p10 = scmp.lt.u32.totalorder %s2104_s10, %s2643_s2 }
  0x4c   : > { %p2107_p6 = pnand %p2105_p5, %p2354_p0 }
  0x4e   : > { %p2108_p9 = pneg %p2107_p6 }
  0x50   : > { %p2113_p13 = pnand %p2111_p10, %p2108_p9 }
  0x52   : > { %2116 = shalt.err (!%p2113_p13)
}
  0x53   : > { %s2117_s15 = scalar_lea.vmem %s218_s19, 2048  ;;  %p2125_p4 = scmp.lt.s32.totalorder %s218_s19, %s218_s19 }
  0x54   : > { %p2118_p1 = scmp.ne.s32.totalorder %s218_s19, %s2117_s15  ;;  %p2126_p7 = scmp.lt.s32.totalorder %s2117_s15, %s2117_s15 }
  0x56   : > { %p2120_p2 = pnand %p2118_p1, %p2354_p0  ;;  %p2127_p8 = por %p2126_p7, %p2125_p4 }
  0x58   : > { %p2121_p3 = pneg %p2120_p2 }
  0x5a   : > { %p2128_p11 = pnand %p2127_p8, %p2121_p3 }
  0x5c   : > { %2131 = shalt.err (!%p2128_p11)
}
  0x5d   : > { %s2663_s1 = smov 8   ;;  %s2664_s13 = smov 128  }
  0x5e   : > { %1988 = dma.hbm_to_vmem [thread:$0]  (!%p2340_p12), %s2643_s2, 2048, %s218_s19, [#allocation6], %s2664_s13, %s2664_s13, %s2663_s1  }
  0x5f   : > { %s2132_s26 = scalar_lea.hbm %s2645_s4, 2048 }
  0x60   : > { %p2133_p5 = scmp.ne.s32.totalorder %s2645_s4, %s2132_s26  ;;  %p2139_p10 = scmp.lt.u32.totalorder %s2132_s26, %s2645_s4 }
  0x62   : > { %p2135_p6 = pnand %p2133_p5, %p2354_p0 }
  0x64   : > { %p2136_p9 = pneg %p2135_p6 }
  0x66   : > { %p2141_p13 = pnand %p2139_p10, %p2136_p9 }
  0x68   : > { %2144 = shalt.err (!%p2141_p13)
}
  0x69   : > { %s2145_s19 = scalar_lea.vmem %s2396_s28, 2048  ;;  %p2153_p4 = scmp.lt.s32.totalorder %s2396_s28, %s2396_s28 }
  0x6a   : > { %p2146_p1 = scmp.ne.s32.totalorder %s2396_s28, %s2145_s19  ;;  %p2154_p7 = scmp.lt.s32.totalorder %s2145_s19, %s2145_s19 }
  0x6c   : > { %p2148_p2 = pnand %p2146_p1, %p2354_p0  ;;  %p2155_p8 = por %p2154_p7, %p2153_p4 }
  0x6e   : > { %p2149_p3 = pneg %p2148_p2 }
  0x70   : > { %p2156_p11 = pnand %p2155_p8, %p2149_p3 }
  0x72   : > { %2159 = shalt.err (!%p2156_p11)
}
  0x73   : > { %1991 = dma.hbm_to_vmem [thread:$0]  (!%p2340_p12), %s2645_s4, 2048, %s2396_s28, [#allocation9], %s2664_s13, %s2664_s13, %s2663_s1  }
  0x74   : > { %p2665_p5 = scmp.ne.s32.totalorder %s2659_s9, 0 }
  0x75   : > { %p2666_p0 = scmp.eq.s32.totalorder (!%p2665_p5), %s2304_s25, 0 }
  0x76   : > { %252 = sbr.rel (%p2665_p5) target bundleno = 1296 (0x510), region = 44 }
  0x7d   : > { %2205 = dma.done.wait (%p2666_p0), [#allocation3], 8192   ;;  %p2667_p6 = pmov %p2666_p0 }
  0x7e   : > { %p2668_p9 = pmov %p2666_p0 }
  0x7f   : > { %2207 = vsyncadd (%p2667_p6), [#allocation3], 4294959104 }
  0x80   : > { %2209 = dma.done.wait (%p2668_p9), [#allocation6], 6144   ;;  %p2669_p10 = pmov %p2666_p0 }
  0x81   : > { %p2670_p13 = pmov %p2666_p0 }
  0x82   : > { %2211 = vsyncadd (%p2669_p10), [#allocation6], 4294961152 }
  0x83   : > { %2213 = dma.done.wait (%p2670_p13), [#allocation9], 2048   ;;  %p2671_p12 = pmov %p2666_p0 }
  0x84   : > { %v322_v0 = vld [vmem:[#allocation7] sm:$0xff]  ;;  %v323_v1 = vld [vmem:[#allocation7 + $0x8] sm:$0xff]  ;;  %v324_v2 = vld [vmem:[#allocation7 + $0x10] sm:$0xff]  ;;  %v2244_v56 = vmov 0.0|0.0   ;;  %s1454_s20 = sshll.u32 %s2304_s25, 7  ;;  %s286_s10 = sand.u32 1, %s2226_s22  }
  0x85   : > { %2215 = vsyncadd (%p2671_p12), [#allocation9], 4294965248  ;;  %v1801_v3 = vpack.c.bf16 %v323_v1, %v322_v0  ;;  %v325_v4 = vld [vmem:[#allocation7 + $0x18] sm:$0xff]  ;;  %v326_v6 = vld [vmem:[#allocation7 + $0x20] sm:$0xff]  ;;  %1833 = vmatprep.subr.bf16.mxu1 %v2244_v56  ;;  %s890_s28 = sshra.s32 %s1454_s20, 3  ;;  %s1452_s17 = sshll.u32 %s286_s10, 7 }
  0x86   : > { %v1805_v5 = vpack.c.bf16 %v325_v4, %v324_v2  ;;  %v327_v7 = vld [vmem:[#allocation7 + $0x28] sm:$0xff]  ;;  %v290_v9 = vld [vmem:[#allocation5] sm:$0xff]  ;;  %v328_v10 = vld [vmem:[#allocation7 + $0x30] sm:$0xff]  ;;  %s1463_s1 = sshll.u32 %s890_s28, 4  ;;  %s2556_s29 = scalar_lea.vmem [#allocation10], %s1452_s17 }
  0x87   : > { %1802 = vmatprep.subr.bf16.mxu0 %v1801_v3  ;;  %v1809_v8 = vpack.c.bf16 %v327_v7, %v326_v6  ;;  %v329_v11 = vld [vmem:[#allocation7 + $0x38] sm:$0xff]  ;;  %1673 = vmatprep.mubr.f32.mxu0 %v290_v9  ;;  %v330_v13 = vld [vmem:[#allocation7 + $0x40] sm:$0xff]  ;;  %v331_v14 = vld [vmem:[#allocation7 + $0x48] sm:$0xff]  ;;  %s2513_s13 = scalar_lea.vmem [#allocation2], %s1463_s1  ;;  %s1464_s11 = sshll.u32 %s2304_s25, 11 }
  0x88   : > { %1804 = vmatpush3.bf16.msra.mxu0 %v1801_v3  ;;  %v1813_v12 = vpack.c.bf16 %v329_v11, %v328_v10  ;;  %v1817_v15 = vpack.c.bf16 %v331_v14, %v330_v13  ;;  %v332_v16 = vld [vmem:[#allocation7 + $0x50] sm:$0xff]  ;;  %v333_v17 = vld [vmem:[#allocation7 + $0x58] sm:$0xff]  ;;  %v334_v19 = vld [vmem:[#allocation7 + $0x60] sm:$0xff]  ;;  %s1348_s16 = sshll.u32 %s2556_s29, 4  ;;  %s2592_s15 = scalar_lea.hbm %s2647_s6, %s1464_s11  ;;  %s2594_s16 = int_to_ptr.vmem [resolvable:$true] %s1348_s16 }
  0x89   : > { %1806 = vmatprep.subr.bf16.mxu0 %v1805_v5  ;;  %v1821_v18 = vpack.c.bf16 %v333_v17, %v332_v16  ;;  %v335_v20 = vld [vmem:[#allocation7 + $0x68] sm:$0xff]  ;;  %v336_v22 = vld [vmem:[#allocation7 + $0x70] sm:$0xff]  ;;  %v337_v23 = vld [vmem:[#allocation7 + $0x78] sm:$0xff]  ;;  %s2600_s30 = scalar_lea.sflag [#allocation4], %s286_s10  ;;  %s2160_s25 = scalar_lea.vmem %s2594_s16, 2048 }
  0x8a   : > { %v1825_v21 = vpack.c.bf16 %v335_v20, %v334_v19  ;;  %v1829_v24 = vpack.c.bf16 %v337_v23, %v336_v22  ;;  %v291_v25 = vld [vmem:[#allocation5 + $0x8] sm:$0xff]  ;;  %v292_v26 = vld [vmem:[#allocation5 + $0x10] sm:$0xff]  ;;  %v293_v27 = vld [vmem:[#allocation5 + $0x18] sm:$0xff]  ;;  %p2161_p1 = scmp.ne.s32.totalorder %s2594_s16, %s2160_s25  ;;  %p2672_p2 = scmp.ne.s32.totalorder %s2657_s7, 0 }
  0x8b   : > { %v294_v28 = vld [vmem:[#allocation5 + $0x20] sm:$0xff]  ;;  %v295_v29 = vld [vmem:[#allocation5 + $0x28] sm:$0xff]  ;;  %v296_v30 = vld [vmem:[#allocation5 + $0x30] sm:$0xff]  ;;  %s2245_s9 = smov [#allocation10]  }
  0x8c   : > { %1808 = vmatpush3.bf16.msra.mxu0 %v1805_v5  ;;  %v297_v31 = vld [vmem:[#allocation5 + $0x38] sm:$0xff]  ;;  %v298_v32 = vld [vmem:[#allocation5 + $0x40] sm:$0xff]  ;;  %v299_v33 = vld [vmem:[#allocation5 + $0x48] sm:$0xff]  ;;  %p2162_p3 = pnand %p2161_p1, %p2672_p2  ;;  %s2164_s12 = sshll.u32 %s2245_s9, 4  ;;  %s2165_s12 = int_to_ptr.vmem [resolvable:$false] %s2164_s12 }
  0x8d   : > { %1810 = vmatprep.subr.bf16.mxu0 %v1809_v8  ;;  %v300_v34 = vld [vmem:[#allocation5 + $0x50] sm:$0xff]  ;;  %v301_v35 = vld [vmem:[#allocation5 + $0x58] sm:$0xff]  ;;  %v302_v36 = vld [vmem:[#allocation5 + $0x60] sm:$0xff]  ;;  %s2166_s20 = scalar_lea.vmem %s2165_s12, 4096  ;;  %p2167_p7 = scmp.lt.s32.totalorder %s2594_s16, %s2165_s12 }
  0x8e   : > { %v303_v37 = vld [vmem:[#allocation5 + $0x68] sm:$0xff]  ;;  %v304_v38 = vld [vmem:[#allocation5 + $0x70] sm:$0xff]  ;;  %v305_v39 = vld [vmem:[#allocation5 + $0x78] sm:$0xff]  ;;  %p2163_p4 = pneg %p2162_p3  ;;  %p2168_p8 = scmp.lt.s32.totalorder %s2166_s20, %s2160_s25 }
  0x8f   : > { %v306_v40 = vld [vmem:[#allocation5 + $0x80] sm:$0xff]  ;;  %v307_v41 = vld [vmem:[#allocation5 + $0x88] sm:$0xff]  ;;  %v308_v42 = vld [vmem:[#allocation5 + $0x90] sm:$0xff] }
  0x90   : > { %1812 = vmatpush3.bf16.msra.mxu0 %v1809_v8  ;;  %v309_v43 = vld [vmem:[#allocation5 + $0x98] sm:$0xff]  ;;  %v310_v44 = vld [vmem:[#allocation5 + $0xa0] sm:$0xff]  ;;  %v311_v45 = vld [vmem:[#allocation5 + $0xa8] sm:$0xff]  ;;  %p2169_p11 = por %p2168_p8, %p2167_p7 }
  0x91   : > { %1814 = vmatprep.subr.bf16.mxu0 %v1813_v12  ;;  %v312_v46 = vld [vmem:[#allocation5 + $0xb0] sm:$0xff]  ;;  %v313_v47 = vld [vmem:[#allocation5 + $0xb8] sm:$0xff]  ;;  %v314_v48 = vld [vmem:[#allocation5 + $0xc0] sm:$0xff] }
  0x92   : > { %v315_v49 = vld [vmem:[#allocation5 + $0xc8] sm:$0xff]  ;;  %v316_v50 = vld [vmem:[#allocation5 + $0xd0] sm:$0xff]  ;;  %v317_v51 = vld [vmem:[#allocation5 + $0xd8] sm:$0xff]  ;;  %p2170_p5 = pnand %p2169_p11, %p2163_p4 }
  0x93   : > { %v318_v52 = vld [vmem:[#allocation5 + $0xe0] sm:$0xff]  ;;  %v319_v53 = vld [vmem:[#allocation5 + $0xe8] sm:$0xff]  ;;  %v320_v54 = vld [vmem:[#allocation5 + $0xf0] sm:$0xff] }
  0x94   : > { %1816 = vmatpush3.bf16.msra.mxu0 %v1813_v12  ;;  %v321_v55 = vld [vmem:[#allocation5 + $0xf8] sm:$0xff]  ;;  %v564_v57 = vld [vmem:[#allocation2 + $0x8] sm:$0xff] }
  0x95   : > { %1818 = vmatprep.subr.bf16.mxu0 %v1817_v15  ;;  %696 = vmatprep.mubr.f32.mxu1 %v564_v57  ;;  %v567_v57 = vld [vmem:[#allocation2 + $0x20] sm:$0xff] }
  0x98   : > { %1820 = vmatpush3.bf16.msra.mxu0 %v1817_v15 }
  0x99   : > { %1822 = vmatprep.subr.bf16.mxu0 %v1821_v18 }
  0x9c   : > { %1824 = vmatpush3.bf16.msra.mxu0 %v1821_v18 }
  0x9d   : > { %1826 = vmatprep.subr.bf16.mxu0 %v1825_v21 }
  0xa0   : > { %1828 = vmatpush3.bf16.msra.mxu0 %v1825_v21 }
  0xa1   : > { %1830 = vmatprep.subr.bf16.mxu0 %v1829_v24 }
  0xa4   : > { %1832 = vmatpush3.bf16.msra.mxu0 %v1829_v24 }
  0xa7   : > { %1674 = vmatmul.mubr.f32.vlgmr.msra.gmra.mrb[0].mxu0 %v291_v25 }
  0xa8   : > { %1676 = vmatprep.mubr.f32.mxu0 %v292_v26 }
  0xab   : > { %1677 = vmatmul.mubr.f32.gmra.mrb[2].mxu0 %v293_v27 }
  0xac   : > { %1679 = vmatprep.mubr.f32.mxu0 %v294_v28 }
  0xaf   : > { %1680 = vmatmul.mubr.f32.gmra.mrb[4].mxu0 %v295_v29 }
  0xb0   : > { %1682 = vmatprep.mubr.f32.mxu0 %v296_v30 }
  0xb3   : > { %1683 = vmatmul.mubr.f32.gmra.mrb[6].mxu0 %v297_v31 }
  0xb4   : > { %1685 = vmatprep.mubr.f32.mxu0 %v298_v32 }
  0xb7   : > { %1686 = vmatmul.mubr.f32.gmra.mrb[8].mxu0 %v299_v33 }
  0xb8   : > { %1688 = vmatprep.mubr.f32.mxu0 %v300_v34 }
  0xbb   : > { %1689 = vmatmul.mubr.f32.gmra.mrb[10].mxu0 %v301_v35 }
  0xbc   : > { %1691 = vmatprep.mubr.f32.mxu0 %v302_v36 }
  0xbf   : > { %1692 = vmatmul.mubr.f32.gmra.mrb[12].mxu0 %v303_v37 }
  0xc0   : > { %1694 = vmatprep.mubr.f32.mxu0 %v304_v38 }
  0xc3   : > { %1695 = vmatmul.mubr.f32.gmra.mrb[14].mxu0 %v305_v39 }
  0xc4   : > { %1697 = vmatprep.mubr.f32.mxu0 %v306_v40 }
  0xc7   : > { %1698 = vmatmul.mubr.f32.gmra.mrb[16].mxu0 %v307_v41 }
  0xc8   : > { %1700 = vmatprep.mubr.f32.mxu0 %v308_v42  ;;  %v927_v42 = vld [vmem:[#allocation8] sm:$0xff] }
  0xcb   : > { %1701 = vmatmul.mubr.f32.gmra.mrb[18].mxu0 %v309_v43  ;;  %v928_v43 = vld [vmem:[#allocation8 + $0x8] sm:$0xff] }
  0xcc   : > { %1703 = vmatprep.mubr.f32.mxu0 %v310_v44  ;;  %v929_v44 = vld [vmem:[#allocation8 + $0x10] sm:$0xff] }
  0xcf   : > { %1704 = vmatmul.mubr.f32.gmra.mrb[20].mxu0 %v311_v45  ;;  %v563_v45 = vld [vmem:[#allocation2] sm:$0xff] }
  0xd0   : > { %1706 = vmatprep.mubr.f32.mxu0 %v312_v46  ;;  %v1881_v46 = vpack.c.bf16 %v928_v43, %v927_v42  ;;  %v607_v43 = vld [vmem:[#allocation2 + $0x160] sm:$0xff] }
  0xd2   : > { %1882 = vmatprep.subr.bf16.mxu0 %v1881_v46 }
  0xd3   : > { %1707 = vmatmul.mubr.f32.gmra.mrb[22].mxu0 %v313_v47  ;;  %v930_v47 = vld [vmem:[#allocation8 + $0x18] sm:$0xff] }
  0xd4   : > { %1709 = vmatprep.mubr.f32.mxu0 %v314_v48  ;;  %v566_v48 = vld [vmem:[#allocation2 + $0x18] sm:$0xff]  ;;  %1884 = vmatpush3.bf16.msra.mxu0 %v1881_v46 }
  0xd7   : > { %1710 = vmatmul.mubr.f32.gmra.mrb[24].mxu0 %v315_v49  ;;  %v1885_v49 = vpack.c.bf16 %v930_v47, %v929_v44  ;;  %v941_v44 = vld [vmem:[#allocation8 + $0x70] sm:$0xff] }
  0xd8   : > { %1712 = vmatprep.mubr.f32.mxu0 %v316_v50  ;;  %v931_v50 = vld [vmem:[#allocation8 + $0x20] sm:$0xff] }
  0xd9   : > { %1886 = vmatprep.subr.bf16.mxu0 %v1885_v49 }
  0xda   : > { %1888 = vmatpush3.bf16.msra.mxu0 %v1885_v49 }
  0xdb   : > { %1713 = vmatmul.mubr.f32.gmra.mrb[26].mxu0 %v317_v51  ;;  %v932_v51 = vld [vmem:[#allocation8 + $0x28] sm:$0xff] }
  0xdc   : > { %1715 = vmatprep.mubr.f32.mxu0 %v318_v52  ;;  %v565_v52 = vld [vmem:[#allocation2 + $0x10] sm:$0xff] }
  0xdf   : > { %1716 = vmatmul.mubr.f32.gmra.mrb[28].mxu0 %v319_v53  ;;  %v1889_v53 = vpack.c.bf16 %v932_v51, %v931_v50  ;;  %v611_v50 = vld [vmem:[#allocation2 + $0x180] sm:$0xff]  ;;  %v614_v51 = vld [vmem:[#allocation2 + $0x198] sm:$0xff] }
  0xe0   : > { %1718 = vmatprep.mubr.f32.mxu0 %v320_v54  ;;  %v568_v54 = vld [vmem:[#allocation2 + $0x28] sm:$0xff] }
  0xe1   : > { %1890 = vmatprep.subr.bf16.mxu0 %v1889_v53 }
  0xe2   : > { %1892 = vmatpush3.bf16.msra.mxu0 %v1889_v53 }
  0xe3   : > { %1719 = vmatmul.mubr.f32.gmra.mrb[30].mxu0 %v321_v55  ;;  %v933_v55 = vld [vmem:[#allocation8 + $0x30] sm:$0xff] }
 0x17a   : > { %v1675_v58 = vpop.f32.mrb[0].mxu0 }
 0x17b   : > { %v404_v59 = vpop.f32.mrb[1].mxu0 }
 0x17c   : > { %v1834_v60 = vpack.c.bf16 %v1675_v58, %v404_v59  ;;  %v570_v59 = vld [vmem:[#allocation2 + $0x38] sm:$0xff] }
 0x17e   : > { %v1678_v61 = vpop.f32.mrb[2].mxu0  ;;  %1835 = vmatpush1.bf16.msra.mxu1 %v1834_v60  ;;  %v935_v60 = vld [vmem:[#allocation8 + $0x40] sm:$0xff] }
 0x17f   : > { %v414_v62 = vpop.f32.mrb[3].mxu0  ;;  %1836 = vmatprep.subr.bf16.mxu1 %v2244_v56 }
 0x180   : > { %v1837_v63 = vpack.c.bf16 %v1678_v61, %v414_v62  ;;  %v936_v61 = vld [vmem:[#allocation8 + $0x48] sm:$0xff]  ;;  %v569_v62 = vld [vmem:[#allocation2 + $0x30] sm:$0xff] }
 0x182   : > { %v1681_v0 = vpop.f32.mrb[4].mxu0  ;;  %1838 = vmatpush1.bf16.msra.mxu1 %v1837_v63  ;;  %v1897_v63 = vpack.c.bf16 %v936_v61, %v935_v60  ;;  %v621_v60 = vld [vmem:[#allocation2 + $0x1d0] sm:$0xff]  ;;  %v624_v61 = vld [vmem:[#allocation2 + $0x1e8] sm:$0xff] }
 0x183   : > { %v424_v1 = vpop.f32.mrb[5].mxu0  ;;  %1839 = vmatprep.subr.bf16.mxu1 %v2244_v56 }
 0x184   : > { %v1840_v2 = vpack.c.bf16 %v1681_v0, %v424_v1  ;;  %v572_v0 = vld [vmem:[#allocation2 + $0x48] sm:$0xff]  ;;  %v937_v1 = vld [vmem:[#allocation8 + $0x50] sm:$0xff] }
 0x186   : > { %v1684_v3 = vpop.f32.mrb[6].mxu0  ;;  %1841 = vmatpush1.bf16.msra.mxu1 %v1840_v2  ;;  %v938_v2 = vld [vmem:[#allocation8 + $0x58] sm:$0xff] }
 0x187   : > { %v434_v4 = vpop.f32.mrb[7].mxu0  ;;  %1842 = vmatprep.subr.bf16.mxu1 %v2244_v56 }
 0x188   : > { %v1843_v5 = vpack.c.bf16 %v1684_v3, %v434_v4  ;;  %v571_v3 = vld [vmem:[#allocation2 + $0x40] sm:$0xff]  ;;  %v1901_v4 = vpack.c.bf16 %v938_v2, %v937_v1 }
 0x189   : > { %v2478_v1 = vld [vmem:[%s2644_s3] ss:$0 sm:$0xff] }
 0x18a   : > { %v1687_v6 = vpop.f32.mrb[8].mxu0  ;;  %1844 = vmatpush1.bf16.msra.mxu1 %v1843_v5  ;;  %v574_v5 = vld [vmem:[#allocation2 + $0x58] sm:$0xff] }
 0x18b   : > { %v444_v7 = vpop.f32.mrb[9].mxu0  ;;  %1845 = vmatprep.subr.bf16.mxu1 %v2244_v56 }
 0x18c   : > { %v1846_v8 = vpack.c.bf16 %v1687_v6, %v444_v7  ;;  %v573_v6 = vld [vmem:[#allocation2 + $0x50] sm:$0xff]  ;;  %v576_v7 = vld [vmem:[#allocation2 + $0x68] sm:$0xff] }
 0x18e   : > { %v1690_v9 = vpop.f32.mrb[10].mxu0  ;;  %1847 = vmatpush1.bf16.msra.mxu1 %v1846_v8  ;;  %v575_v8 = vld [vmem:[#allocation2 + $0x60] sm:$0xff] }
 0x18f   : > { %v454_v10 = vpop.f32.mrb[11].mxu0  ;;  %1848 = vmatprep.subr.bf16.mxu1 %v2244_v56 }
 0x190   : > { %v1849_v11 = vpack.c.bf16 %v1690_v9, %v454_v10  ;;  %v578_v9 = vld [vmem:[#allocation2 + $0x78] sm:$0xff]  ;;  %v577_v10 = vld [vmem:[#allocation2 + $0x70] sm:$0xff] }
 0x192   : > { %v1693_v12 = vpop.f32.mrb[12].mxu0  ;;  %1850 = vmatpush1.bf16.msra.mxu1 %v1849_v11  ;;  %v580_v11 = vld [vmem:[#allocation2 + $0x88] sm:$0xff] }
 0x193   : > { %v464_v13 = vpop.f32.mrb[13].mxu0  ;;  %1851 = vmatprep.subr.bf16.mxu1 %v2244_v56 }
 0x194   : > { %v1852_v14 = vpack.c.bf16 %v1693_v12, %v464_v13  ;;  %v579_v12 = vld [vmem:[#allocation2 + $0x80] sm:$0xff]  ;;  %v582_v13 = vld [vmem:[#allocation2 + $0x98] sm:$0xff] }
 0x196   : > { %v1696_v15 = vpop.f32.mrb[14].mxu0  ;;  %1853 = vmatpush1.bf16.msra.mxu1 %v1852_v14  ;;  %v581_v14 = vld [vmem:[#allocation2 + $0x90] sm:$0xff] }
 0x197   : > { %v474_v16 = vpop.f32.mrb[15].mxu0  ;;  %1854 = vmatprep.subr.bf16.mxu1 %v2244_v56 }
 0x198   : > { %v1855_v17 = vpack.c.bf16 %v1696_v15, %v474_v16  ;;  %v584_v15 = vld [vmem:[#allocation2 + $0xa8] sm:$0xff]  ;;  %v583_v16 = vld [vmem:[#allocation2 + $0xa0] sm:$0xff] }
 0x19a   : > { %v1699_v18 = vpop.f32.mrb[16].mxu0  ;;  %1856 = vmatpush1.bf16.msra.mxu1 %v1855_v17  ;;  %v586_v17 = vld [vmem:[#allocation2 + $0xb8] sm:$0xff] }
 0x19b   : > { %v484_v19 = vpop.f32.mrb[17].mxu0  ;;  %1857 = vmatprep.subr.bf16.mxu1 %v2244_v56 }
 0x19c   : > { %v1858_v20 = vpack.c.bf16 %v1699_v18, %v484_v19  ;;  %v585_v18 = vld [vmem:[#allocation2 + $0xb0] sm:$0xff]  ;;  %v588_v19 = vld [vmem:[#allocation2 + $0xc8] sm:$0xff] }
 0x19e   : > { %v1702_v21 = vpop.f32.mrb[18].mxu0  ;;  %1859 = vmatpush1.bf16.msra.mxu1 %v1858_v20  ;;  %v587_v20 = vld [vmem:[#allocation2 + $0xc0] sm:$0xff] }
 0x19f   : > { %v494_v22 = vpop.f32.mrb[19].mxu0  ;;  %1860 = vmatprep.subr.bf16.mxu1 %v2244_v56 }
 0x1a0   : > { %v1861_v23 = vpack.c.bf16 %v1702_v21, %v494_v22  ;;  %v590_v21 = vld [vmem:[#allocation2 + $0xd8] sm:$0xff]  ;;  %v589_v22 = vld [vmem:[#allocation2 + $0xd0] sm:$0xff] }
 0x1a2   : > { %v1705_v24 = vpop.f32.mrb[20].mxu0  ;;  %1862 = vmatpush1.bf16.msra.mxu1 %v1861_v23  ;;  %v592_v23 = vld [vmem:[#allocation2 + $0xe8] sm:$0xff] }
 0x1a3   : > { %v504_v25 = vpop.f32.mrb[21].mxu0  ;;  %1863 = vmatprep.subr.bf16.mxu1 %v2244_v56 }
 0x1a4   : > { %v1864_v26 = vpack.c.bf16 %v1705_v24, %v504_v25  ;;  %v591_v24 = vld [vmem:[#allocation2 + $0xe0] sm:$0xff]  ;;  %v594_v25 = vld [vmem:[#allocation2 + $0xf8] sm:$0xff] }
 0x1a6   : > { %v1708_v27 = vpop.f32.mrb[22].mxu0  ;;  %1865 = vmatpush1.bf16.msra.mxu1 %v1864_v26  ;;  %v593_v26 = vld [vmem:[#allocation2 + $0xf0] sm:$0xff] }
 0x1a7   : > { %v514_v28 = vpop.f32.mrb[23].mxu0  ;;  %1866 = vmatprep.subr.bf16.mxu1 %v2244_v56 }
 0x1a8   : > { %v1867_v29 = vpack.c.bf16 %v1708_v27, %v514_v28  ;;  %v596_v27 = vld [vmem:[#allocation2 + $0x108] sm:$0xff]  ;;  %v595_v28 = vld [vmem:[#allocation2 + $0x100] sm:$0xff] }
 0x1aa   : > { %v1711_v30 = vpop.f32.mrb[24].mxu0  ;;  %1868 = vmatpush1.bf16.msra.mxu1 %v1867_v29  ;;  %v598_v29 = vld [vmem:[#allocation2 + $0x118] sm:$0xff] }
 0x1ab   : > { %v524_v31 = vpop.f32.mrb[25].mxu0  ;;  %1869 = vmatprep.subr.bf16.mxu1 %v2244_v56 }
 0x1ac   : > { %v1870_v32 = vpack.c.bf16 %v1711_v30, %v524_v31  ;;  %v597_v30 = vld [vmem:[#allocation2 + $0x110] sm:$0xff]  ;;  %v600_v31 = vld [vmem:[#allocation2 + $0x128] sm:$0xff] }
 0x1ae   : > { %v1714_v33 = vpop.f32.mrb[26].mxu0  ;;  %1871 = vmatpush1.bf16.msra.mxu1 %v1870_v32  ;;  %v599_v32 = vld [vmem:[#allocation2 + $0x120] sm:$0xff] }
 0x1af   : > { %v534_v34 = vpop.f32.mrb[27].mxu0  ;;  %1872 = vmatprep.subr.bf16.mxu1 %v2244_v56 }
 0x1b0   : > { %v1873_v35 = vpack.c.bf16 %v1714_v33, %v534_v34  ;;  %v602_v33 = vld [vmem:[#allocation2 + $0x138] sm:$0xff]  ;;  %v601_v34 = vld [vmem:[#allocation2 + $0x130] sm:$0xff] }
 0x1b2   : > { %v1717_v36 = vpop.f32.mrb[28].mxu0  ;;  %1874 = vmatpush1.bf16.msra.mxu1 %v1873_v35  ;;  %v604_v35 = vld [vmem:[#allocation2 + $0x148] sm:$0xff] }
 0x1b3   : > { %v544_v37 = vpop.f32.mrb[29].mxu0  ;;  %1875 = vmatprep.subr.bf16.mxu1 %v2244_v56 }
 0x1b4   : > { %v1876_v38 = vpack.c.bf16 %v1717_v36, %v544_v37  ;;  %v603_v36 = vld [vmem:[#allocation2 + $0x140] sm:$0xff]  ;;  %v606_v37 = vld [vmem:[#allocation2 + $0x158] sm:$0xff] }
 0x1b6   : > { %v1720_v39 = vpop.f32.mrb[30].mxu0  ;;  %1877 = vmatpush1.bf16.msra.mxu1 %v1876_v38  ;;  %v605_v38 = vld [vmem:[#allocation2 + $0x150] sm:$0xff] }
 0x1b7   : > { %v554_v40 = vpop.f32.mrb[31].mxu0  ;;  %1878 = vmatprep.subr.bf16.mxu1 %v2244_v56  ;;  %v934_v56 = vld [vmem:[#allocation8 + $0x38] sm:$0xff] }
 0x1b8   : > { %v1879_v41 = vpack.c.bf16 %v1720_v39, %v554_v40  ;;  %v1893_v58 = vpack.c.bf16 %v934_v56, %v933_v55  ;;  %v939_v39 = vld [vmem:[#allocation8 + $0x60] sm:$0xff]  ;;  %v940_v40 = vld [vmem:[#allocation8 + $0x68] sm:$0xff]  ;;  %v618_v55 = vld [vmem:[#allocation2 + $0x1b8] sm:$0xff] }
 0x1b9   : > { %v1905_v42 = vpack.c.bf16 %v940_v40, %v939_v39  ;;  %v617_v56 = vld [vmem:[#allocation2 + $0x1b0] sm:$0xff] }
 0x1ba   : > { %1880 = vmatpush1.bf16.msra.mxu1 %v1879_v41  ;;  %1894 = vmatprep.subr.bf16.mxu0 %v1893_v58  ;;  %v608_v41 = vld [vmem:[#allocation2 + $0x168] sm:$0xff] }
 0x1bb   : > { %1945 = vmatprep.subr.bf16.mxu1 %v1881_v46  ;;  %1896 = vmatpush3.bf16.msra.mxu0 %v1893_v58 }
 0x1bc   : > { %1898 = vmatprep.subr.bf16.mxu0 %v1897_v63 }
 0x1bd   : > { %697 = vmatmul.mubr.f32.vlgmr.msra.gmra.mrb[0].mxu1 %v563_v45  ;;  %v942_v45 = vld [vmem:[#allocation8 + $0x78] sm:$0xff] }
 0x1be   : > { %701 = vmatprep.mubr.f32.mxu1 %v566_v48  ;;  %1953 = vmatpush3.bf16.msra.mxu1 %v1881_v46  ;;  %v610_v46 = vld [vmem:[#allocation2 + $0x178] sm:$0xff]  ;;  %v1909_v47 = vpack.c.bf16 %v942_v45, %v941_v44  ;;  %v609_v48 = vld [vmem:[#allocation2 + $0x170] sm:$0xff] }
 0x1bf   : > { %1946 = vmatprep.subr.bf16.mxu1 %v1885_v49  ;;  %1900 = vmatpush3.bf16.msra.mxu0 %v1897_v63 }
 0x1c0   : > { %1902 = vmatprep.subr.bf16.mxu0 %v1901_v4 }
 0x1c1   : > { %702 = vmatmul.mubr.f32.gmra.mrb[2].mxu1 %v565_v52  ;;  %v613_v52 = vld [vmem:[#allocation2 + $0x190] sm:$0xff] }
 0x1c2   : > { %706 = vmatprep.mubr.f32.mxu1 %v568_v54  ;;  %1954 = vmatpush3.bf16.msra.mxu1 %v1885_v49  ;;  %v612_v49 = vld [vmem:[#allocation2 + $0x188] sm:$0xff]  ;;  %v615_v54 = vld [vmem:[#allocation2 + $0x1a0] sm:$0xff] }
 0x1c3   : > { %1947 = vmatprep.subr.bf16.mxu1 %v1889_v53  ;;  %1904 = vmatpush3.bf16.msra.mxu0 %v1901_v4 }
 0x1c4   : > { %1906 = vmatprep.subr.bf16.mxu0 %v1905_v42 }
 0x1c5   : > { %707 = vmatmul.mubr.f32.gmra.mrb[4].mxu1 %v567_v57  ;;  %v620_v57 = vld [vmem:[#allocation2 + $0x1c8] sm:$0xff] }
 0x1c6   : > { %711 = vmatprep.mubr.f32.mxu1 %v570_v59  ;;  %1955 = vmatpush3.bf16.msra.mxu1 %v1889_v53  ;;  %v616_v53 = vld [vmem:[#allocation2 + $0x1a8] sm:$0xff]  ;;  %v622_v59 = vld [vmem:[#allocation2 + $0x1d8] sm:$0xff] }
 0x1c7   : > { %1948 = vmatprep.subr.bf16.mxu1 %v1893_v58  ;;  %1908 = vmatpush3.bf16.msra.mxu0 %v1905_v42 }
 0x1c8   : > { %1910 = vmatprep.subr.bf16.mxu0 %v1909_v47 }
 0x1c9   : > { %712 = vmatmul.mubr.f32.gmra.mrb[6].mxu1 %v569_v62  ;;  %v623_v62 = vld [vmem:[#allocation2 + $0x1e0] sm:$0xff] }
 0x1ca   : > { %716 = vmatprep.mubr.f32.mxu1 %v572_v0  ;;  %1956 = vmatpush3.bf16.msra.mxu1 %v1893_v58  ;;  %v619_v58 = vld [vmem:[#allocation2 + $0x1c0] sm:$0xff]  ;;  %v625_v0 = vld [vmem:[#allocation2 + $0x1f0] sm:$0xff] }
 0x1cb   : > { %1949 = vmatprep.subr.bf16.mxu1 %v1897_v63  ;;  %1912 = vmatpush3.bf16.msra.mxu0 %v1909_v47 }
 0x1cd   : > { %717 = vmatmul.mubr.f32.gmra.mrb[8].mxu1 %v571_v3 }
 0x1ce   : > { %721 = vmatprep.mubr.f32.mxu1 %v574_v5  ;;  %1957 = vmatpush3.bf16.msra.mxu1 %v1897_v63  ;;  %v626_v63 = vld [vmem:[#allocation2 + $0x1f8] sm:$0xff] }
 0x1cf   : > { %1950 = vmatprep.subr.bf16.mxu1 %v1901_v4 }
 0x1d1   : > { %722 = vmatmul.mubr.f32.gmra.mrb[10].mxu1 %v573_v6 }
 0x1d2   : > { %726 = vmatprep.mubr.f32.mxu1 %v576_v7  ;;  %1958 = vmatpush3.bf16.msra.mxu1 %v1901_v4 }
 0x1d3   : > { %1951 = vmatprep.subr.bf16.mxu1 %v1905_v42 }
 0x1d5   : > { %727 = vmatmul.mubr.f32.gmra.mrb[12].mxu1 %v575_v8 }
 0x1d6   : > { %731 = vmatprep.mubr.f32.mxu1 %v578_v9  ;;  %1959 = vmatpush3.bf16.msra.mxu1 %v1905_v42 }
 0x1d7   : > { %1952 = vmatprep.subr.bf16.mxu1 %v1909_v47 }
 0x1d9   : > { %732 = vmatmul.mubr.f32.gmra.mrb[14].mxu1 %v577_v10 }
 0x1da   : > { %736 = vmatprep.mubr.f32.mxu1 %v580_v11  ;;  %1960 = vmatpush3.bf16.msra.mxu1 %v1909_v47 }
 0x1dd   : > { %737 = vmatmul.mubr.f32.gmra.mrb[16].mxu1 %v579_v12 }
 0x1de   : > { %741 = vmatprep.mubr.f32.mxu1 %v582_v13 }
 0x1e1   : > { %742 = vmatmul.mubr.f32.gmra.mrb[18].mxu1 %v581_v14 }
 0x1e2   : > { %746 = vmatprep.mubr.f32.mxu1 %v584_v15 }
 0x1e5   : > { %747 = vmatmul.mubr.f32.gmra.mrb[20].mxu1 %v583_v16 }
 0x1e6   : > { %751 = vmatprep.mubr.f32.mxu1 %v586_v17 }
 0x1e9   : > { %752 = vmatmul.mubr.f32.gmra.mrb[22].mxu1 %v585_v18 }
 0x1ea   : > { %756 = vmatprep.mubr.f32.mxu1 %v588_v19 }
 0x1ed   : > { %757 = vmatmul.mubr.f32.gmra.mrb[24].mxu1 %v587_v20 }
 0x1ee   : > { %761 = vmatprep.mubr.f32.mxu1 %v590_v21 }
 0x1f1   : > { %762 = vmatmul.mubr.f32.gmra.mrb[26].mxu1 %v589_v22 }
 0x1f2   : > { %766 = vmatprep.mubr.f32.mxu1 %v592_v23 }
 0x1f5   : > { %767 = vmatmul.mubr.f32.gmra.mrb[28].mxu1 %v591_v24 }
 0x1f6   : > { %771 = vmatprep.mubr.f32.mxu1 %v594_v25 }
 0x1f9   : > { %772 = vmatmul.mubr.f32.gmra.mrb[30].mxu1 %v593_v26 }
 0x1fa   : > { %776 = vmatprep.mubr.f32.mxu1 %v596_v27 }
 0x1fd   : > { %777 = vmatmul.mubr.f32.gmra.mrb[32].mxu1 %v595_v28 }
 0x1fe   : > { %781 = vmatprep.mubr.f32.mxu1 %v598_v29 }
 0x201   : > { %782 = vmatmul.mubr.f32.gmra.mrb[34].mxu1 %v597_v30 }
 0x202   : > { %786 = vmatprep.mubr.f32.mxu1 %v600_v31 }
 0x205   : > { %787 = vmatmul.mubr.f32.gmra.mrb[36].mxu1 %v599_v32 }
 0x206   : > { %791 = vmatprep.mubr.f32.mxu1 %v602_v33 }
 0x209   : > { %792 = vmatmul.mubr.f32.gmra.mrb[38].mxu1 %v601_v34 }
 0x20a   : > { %796 = vmatprep.mubr.f32.mxu1 %v604_v35 }
 0x20d   : > { %797 = vmatmul.mubr.f32.gmra.mrb[40].mxu1 %v603_v36 }
 0x20e   : > { %801 = vmatprep.mubr.f32.mxu1 %v606_v37 }
 0x211   : > { %802 = vmatmul.mubr.f32.gmra.mrb[42].mxu1 %v605_v38 }
 0x212   : > { %806 = vmatprep.mubr.f32.mxu1 %v608_v41 }
 0x215   : > { %807 = vmatmul.mubr.f32.gmra.mrb[44].mxu1 %v607_v43 }
 0x216   : > { %811 = vmatprep.mubr.f32.mxu1 %v610_v46 }
 0x219   : > { %812 = vmatmul.mubr.f32.gmra.mrb[46].mxu1 %v609_v48 }
 0x21a   : > { %816 = vmatprep.mubr.f32.mxu1 %v612_v49 }
 0x21d   : > { %817 = vmatmul.mubr.f32.gmra.mrb[48].mxu1 %v611_v50 }
 0x21e   : > { %821 = vmatprep.mubr.f32.mxu1 %v614_v51 }
 0x221   : > { %822 = vmatmul.mubr.f32.gmra.mrb[50].mxu1 %v613_v52 }
 0x222   : > { %826 = vmatprep.mubr.f32.mxu1 %v616_v53 }
 0x225   : > { %827 = vmatmul.mubr.f32.gmra.mrb[52].mxu1 %v615_v54 }
 0x226   : > { %831 = vmatprep.mubr.f32.mxu1 %v618_v55 }
 0x229   : > { %832 = vmatmul.mubr.f32.gmra.mrb[54].mxu1 %v617_v56 }
 0x22a   : > { %836 = vmatprep.mubr.f32.mxu1 %v620_v57 }
 0x22d   : > { %837 = vmatmul.mubr.f32.gmra.mrb[56].mxu1 %v619_v58 }
 0x22e   : > { %841 = vmatprep.mubr.f32.mxu1 %v622_v59 }
 0x231   : > { %842 = vmatmul.mubr.f32.gmra.mrb[58].mxu1 %v621_v60 }
 0x232   : > { %846 = vmatprep.mubr.f32.mxu1 %v624_v61 }
 0x235   : > { %847 = vmatmul.mubr.f32.gmra.mrb[60].mxu1 %v623_v62 }
 0x236   : > { %851 = vmatprep.mubr.f32.mxu1 %v626_v63 }
 0x239   : > { %852 = vmatmul.mubr.f32.gmra.mrb[62].mxu1 %v625_v0 }
 0x290   : > { %v698_v2 = vpop.f32.mrb[0].mxu1 }
 0x291   : > { %v699_v3 = vadd.f32 %v2478_v1, %v698_v2  ;;  %v700_v4 = vpop.f32.mrb[1].mxu1 }
 0x293   : > { %v857_v5 = vmax.f32 %v699_v3, 0.0 }
 0x294   : > { %v703_v6 = vpop.f32.mrb[2].mxu1 }
 0x295   : > { %v704_v7 = vadd.f32 %v2478_v1, %v703_v6  ;;  %v705_v8 = vpop.f32.mrb[3].mxu1  ;;  %1753 = vmatprep.mubr.f32.mxu0 %v857_v5 }
 0x297   : > { %v858_v9 = vmax.f32 %v704_v7, 0.0 }
 0x298   : > { %v708_v10 = vpop.f32.mrb[4].mxu1 }
 0x299   : > { %v709_v11 = vadd.f32 %v2478_v1, %v708_v10  ;;  %v710_v12 = vpop.f32.mrb[5].mxu1  ;;  %1754 = vmatmul.mubr.f32.vlgmr.msra.gmra.mrb[32].mxu0 %v858_v9 }
 0x29b   : > { %v859_v13 = vmax.f32 %v709_v11, 0.0 }
 0x29c   : > { %v713_v14 = vpop.f32.mrb[6].mxu1 }
 0x29d   : > { %v714_v15 = vadd.f32 %v2478_v1, %v713_v14  ;;  %v715_v16 = vpop.f32.mrb[7].mxu1  ;;  %1756 = vmatprep.mubr.f32.mxu0 %v859_v13 }
 0x29f   : > { %v860_v17 = vmax.f32 %v714_v15, 0.0 }
 0x2a0   : > { %v718_v18 = vpop.f32.mrb[8].mxu1 }
 0x2a1   : > { %v719_v19 = vadd.f32 %v2478_v1, %v718_v18  ;;  %v720_v20 = vpop.f32.mrb[9].mxu1  ;;  %1757 = vmatmul.mubr.f32.gmra.mrb[34].mxu0 %v860_v17 }
 0x2a3   : > { %v861_v21 = vmax.f32 %v719_v19, 0.0 }
 0x2a4   : > { %v723_v22 = vpop.f32.mrb[10].mxu1 }
 0x2a5   : > { %v724_v23 = vadd.f32 %v2478_v1, %v723_v22  ;;  %v725_v24 = vpop.f32.mrb[11].mxu1  ;;  %1759 = vmatprep.mubr.f32.mxu0 %v861_v21 }
 0x2a7   : > { %v862_v25 = vmax.f32 %v724_v23, 0.0 }
 0x2a8   : > { %v728_v26 = vpop.f32.mrb[12].mxu1 }
 0x2a9   : > { %v729_v27 = vadd.f32 %v2478_v1, %v728_v26  ;;  %v730_v28 = vpop.f32.mrb[13].mxu1  ;;  %1760 = vmatmul.mubr.f32.gmra.mrb[36].mxu0 %v862_v25 }
 0x2ab   : > { %v863_v29 = vmax.f32 %v729_v27, 0.0 }
 0x2ac   : > { %v733_v30 = vpop.f32.mrb[14].mxu1 }
 0x2ad   : > { %v734_v31 = vadd.f32 %v2478_v1, %v733_v30  ;;  %v735_v32 = vpop.f32.mrb[15].mxu1  ;;  %1762 = vmatprep.mubr.f32.mxu0 %v863_v29 }
 0x2af   : > { %v864_v33 = vmax.f32 %v734_v31, 0.0 }
 0x2b0   : > { %v738_v34 = vpop.f32.mrb[16].mxu1 }
 0x2b1   : > { %v739_v35 = vadd.f32 %v2478_v1, %v738_v34  ;;  %v740_v36 = vpop.f32.mrb[17].mxu1  ;;  %1763 = vmatmul.mubr.f32.gmra.mrb[38].mxu0 %v864_v33 }
 0x2b3   : > { %v865_v37 = vmax.f32 %v739_v35, 0.0 }
 0x2b4   : > { %v743_v38 = vpop.f32.mrb[18].mxu1 }
 0x2b5   : > { %v744_v39 = vadd.f32 %v2478_v1, %v743_v38  ;;  %v745_v40 = vpop.f32.mrb[19].mxu1  ;;  %1765 = vmatprep.mubr.f32.mxu0 %v865_v37 }
 0x2b7   : > { %v866_v41 = vmax.f32 %v744_v39, 0.0 }
 0x2b8   : > { %v748_v42 = vpop.f32.mrb[20].mxu1 }
 0x2b9   : > { %v749_v43 = vadd.f32 %v2478_v1, %v748_v42  ;;  %v750_v44 = vpop.f32.mrb[21].mxu1  ;;  %1766 = vmatmul.mubr.f32.gmra.mrb[40].mxu0 %v866_v41 }
 0x2bb   : > { %v867_v45 = vmax.f32 %v749_v43, 0.0 }
 0x2bc   : > { %v753_v46 = vpop.f32.mrb[22].mxu1 }
 0x2bd   : > { %v754_v47 = vadd.f32 %v2478_v1, %v753_v46  ;;  %v755_v48 = vpop.f32.mrb[23].mxu1  ;;  %1768 = vmatprep.mubr.f32.mxu0 %v867_v45 }
 0x2bf   : > { %v868_v49 = vmax.f32 %v754_v47, 0.0 }
 0x2c0   : > { %v758_v50 = vpop.f32.mrb[24].mxu1 }
 0x2c1   : > { %v759_v51 = vadd.f32 %v2478_v1, %v758_v50  ;;  %v760_v52 = vpop.f32.mrb[25].mxu1  ;;  %1769 = vmatmul.mubr.f32.gmra.mrb[42].mxu0 %v868_v49 }
 0x2c3   : > { %v869_v53 = vmax.f32 %v759_v51, 0.0 }
 0x2c4   : > { %v763_v54 = vpop.f32.mrb[26].mxu1 }
 0x2c5   : > { %v764_v55 = vadd.f32 %v2478_v1, %v763_v54  ;;  %v765_v56 = vpop.f32.mrb[27].mxu1  ;;  %1771 = vmatprep.mubr.f32.mxu0 %v869_v53 }
 0x2c7   : > { %v870_v57 = vmax.f32 %v764_v55, 0.0 }
 0x2c8   : > { %v768_v58 = vpop.f32.mrb[28].mxu1 }
 0x2c9   : > { %v769_v59 = vadd.f32 %v2478_v1, %v768_v58  ;;  %v770_v60 = vpop.f32.mrb[29].mxu1  ;;  %1772 = vmatmul.mubr.f32.gmra.mrb[44].mxu0 %v870_v57 }
 0x2cb   : > { %v871_v61 = vmax.f32 %v769_v59, 0.0 }
 0x2cc   : > { %v773_v62 = vpop.f32.mrb[30].mxu1 }
 0x2cd   : > { %v774_v63 = vadd.f32 %v2478_v1, %v773_v62  ;;  %v775_v0 = vpop.f32.mrb[31].mxu1  ;;  %1774 = vmatprep.mubr.f32.mxu0 %v871_v61 }
 0x2cf   : > { %v872_v2 = vmax.f32 %v774_v63, 0.0 }
 0x2d0   : > { %v778_v3 = vpop.f32.mrb[32].mxu1 }
 0x2d1   : > { %v779_v4 = vadd.f32 %v2478_v1, %v778_v3  ;;  %v780_v5 = vpop.f32.mrb[33].mxu1  ;;  %1775 = vmatmul.mubr.f32.gmra.mrb[46].mxu0 %v872_v2 }
 0x2d3   : > { %v873_v6 = vmax.f32 %v779_v4, 0.0  ;;  %v896_v4 = vld [vmem:[%s2513_s13 + $0x8] sm:$0xff] }
 0x2d4   : > { %v783_v7 = vpop.f32.mrb[34].mxu1 }
 0x2d5   : > { %v784_v8 = vadd.f32 %v2478_v1, %v783_v7  ;;  %v785_v9 = vpop.f32.mrb[35].mxu1  ;;  %1777 = vmatprep.mubr.f32.mxu0 %v873_v6 }
 0x2d7   : > { %v874_v10 = vmax.f32 %v784_v8, 0.0 }
 0x2d8   : > { %v788_v11 = vpop.f32.mrb[36].mxu1 }
 0x2d9   : > { %v789_v12 = vadd.f32 %v2478_v1, %v788_v11  ;;  %v790_v13 = vpop.f32.mrb[37].mxu1  ;;  %1778 = vmatmul.mubr.f32.gmra.mrb[48].mxu0 %v874_v10 }
 0x2db   : > { %v875_v14 = vmax.f32 %v789_v12, 0.0 }
 0x2dc   : > { %v793_v15 = vpop.f32.mrb[38].mxu1 }
 0x2dd   : > { %v794_v16 = vadd.f32 %v2478_v1, %v793_v15  ;;  %v795_v17 = vpop.f32.mrb[39].mxu1  ;;  %1780 = vmatprep.mubr.f32.mxu0 %v875_v14 }
 0x2df   : > { %v876_v18 = vmax.f32 %v794_v16, 0.0 }
 0x2e0   : > { %v798_v19 = vpop.f32.mrb[40].mxu1 }
 0x2e1   : > { %v799_v20 = vadd.f32 %v2478_v1, %v798_v19  ;;  %v800_v21 = vpop.f32.mrb[41].mxu1  ;;  %1781 = vmatmul.mubr.f32.gmra.mrb[50].mxu0 %v876_v18 }
 0x2e3   : > { %v877_v22 = vmax.f32 %v799_v20, 0.0 }
 0x2e4   : > { %v803_v23 = vpop.f32.mrb[42].mxu1 }
 0x2e5   : > { %v804_v24 = vadd.f32 %v2478_v1, %v803_v23  ;;  %v805_v25 = vpop.f32.mrb[43].mxu1  ;;  %1783 = vmatprep.mubr.f32.mxu0 %v877_v22 }
 0x2e7   : > { %v878_v26 = vmax.f32 %v804_v24, 0.0 }
 0x2e8   : > { %v808_v27 = vpop.f32.mrb[44].mxu1 }
 0x2e9   : > { %v809_v28 = vadd.f32 %v2478_v1, %v808_v27  ;;  %v810_v29 = vpop.f32.mrb[45].mxu1  ;;  %1784 = vmatmul.mubr.f32.gmra.mrb[52].mxu0 %v878_v26 }
 0x2eb   : > { %v879_v30 = vmax.f32 %v809_v28, 0.0 }
 0x2ec   : > { %v813_v31 = vpop.f32.mrb[46].mxu1 }
 0x2ed   : > { %v814_v32 = vadd.f32 %v2478_v1, %v813_v31  ;;  %v815_v33 = vpop.f32.mrb[47].mxu1  ;;  %1786 = vmatprep.mubr.f32.mxu0 %v879_v30 }
 0x2ef   : > { %v880_v34 = vmax.f32 %v814_v32, 0.0 }
 0x2f0   : > { %v818_v35 = vpop.f32.mrb[48].mxu1 }
 0x2f1   : > { %v819_v36 = vadd.f32 %v2478_v1, %v818_v35  ;;  %v820_v37 = vpop.f32.mrb[49].mxu1  ;;  %1787 = vmatmul.mubr.f32.gmra.mrb[54].mxu0 %v880_v34 }
 0x2f2   : > { %1237 = vmatprep.mubr.f32.mxu0 %v896_v4  ;;  %v912_v4 = vld [vmem:[%s2513_s13 + $0x88] sm:$0xff] }
 0x2f3   : > { %v881_v38 = vmax.f32 %v819_v36, 0.0 }
 0x2f4   : > { %v823_v39 = vpop.f32.mrb[50].mxu1 }
 0x2f5   : > { %v824_v40 = vadd.f32 %v2478_v1, %v823_v39  ;;  %v825_v41 = vpop.f32.mrb[51].mxu1  ;;  %1789 = vmatprep.mubr.f32.mxu1 %v881_v38 }
 0x2f7   : > { %v882_v42 = vmax.f32 %v824_v40, 0.0 }
 0x2f8   : > { %v828_v43 = vpop.f32.mrb[52].mxu1 }
 0x2f9   : > { %v829_v44 = vadd.f32 %v2478_v1, %v828_v43  ;;  %v830_v45 = vpop.f32.mrb[53].mxu1  ;;  %1790 = vmatmul.mubr.f32.vlgmr.msra.gmra.mrb[64].mxu1 %v882_v42 }
 0x2fb   : > { %v883_v46 = vmax.f32 %v829_v44, 0.0 }
 0x2fc   : > { %v833_v47 = vpop.f32.mrb[54].mxu1 }
 0x2fd   : > { %v834_v48 = vadd.f32 %v2478_v1, %v833_v47  ;;  %v835_v49 = vpop.f32.mrb[55].mxu1  ;;  %1792 = vmatprep.mubr.f32.mxu1 %v883_v46 }
 0x2ff   : > { %v884_v50 = vmax.f32 %v834_v48, 0.0 }
 0x300   : > { %v838_v51 = vpop.f32.mrb[56].mxu1 }
 0x301   : > { %v839_v52 = vadd.f32 %v2478_v1, %v838_v51  ;;  %v840_v53 = vpop.f32.mrb[57].mxu1  ;;  %1793 = vmatmul.mubr.f32.gmra.mrb[66].mxu1 %v884_v50 }
 0x302   : > { %v898_v53 = vld [vmem:[%s2513_s13 + $0x18] sm:$0xff] }
 0x303   : > { %v885_v54 = vmax.f32 %v839_v52, 0.0  ;;  %v895_v52 = vld [vmem:[%s2513_s13] sm:$0xff] }
 0x304   : > { %v843_v55 = vpop.f32.mrb[58].mxu1 }
 0x305   : > { %v844_v56 = vadd.f32 %v2478_v1, %v843_v55  ;;  %v845_v57 = vpop.f32.mrb[59].mxu1  ;;  %1795 = vmatprep.mubr.f32.mxu1 %v885_v54  ;;  %v897_v54 = vld [vmem:[%s2513_s13 + $0x10] sm:$0xff]  ;;  %v900_v55 = vld [vmem:[%s2513_s13 + $0x28] sm:$0xff] }
 0x306   : > { %v902_v57 = vld [vmem:[%s2513_s13 + $0x38] sm:$0xff] }
 0x307   : > { %v886_v58 = vmax.f32 %v844_v56, 0.0  ;;  %v899_v56 = vld [vmem:[%s2513_s13 + $0x20] sm:$0xff] }
 0x308   : > { %v848_v59 = vpop.f32.mrb[60].mxu1 }
 0x309   : > { %v849_v60 = vadd.f32 %v2478_v1, %v848_v59  ;;  %v850_v61 = vpop.f32.mrb[61].mxu1  ;;  %1796 = vmatmul.mubr.f32.gmra.mrb[68].mxu1 %v886_v58  ;;  %v901_v58 = vld [vmem:[%s2513_s13 + $0x30] sm:$0xff]  ;;  %v904_v59 = vld [vmem:[%s2513_s13 + $0x48] sm:$0xff] }
 0x30a   : > { %v906_v61 = vld [vmem:[%s2513_s13 + $0x58] sm:$0xff] }
 0x30b   : > { %v887_v62 = vmax.f32 %v849_v60, 0.0  ;;  %v903_v60 = vld [vmem:[%s2513_s13 + $0x40] sm:$0xff] }
 0x30c   : > { %v853_v63 = vpop.f32.mrb[62].mxu1 }
 0x30d   : > { %v854_v0 = vadd.f32 %v2478_v1, %v853_v63  ;;  %v855_v2 = vpop.f32.mrb[63].mxu1  ;;  %1798 = vmatprep.mubr.f32.mxu1 %v887_v62  ;;  %v905_v62 = vld [vmem:[%s2513_s13 + $0x50] sm:$0xff]  ;;  %v908_v63 = vld [vmem:[%s2513_s13 + $0x68] sm:$0xff] }
 0x30e   : > { %v910_v2 = vld [vmem:[%s2513_s13 + $0x78] sm:$0xff] }
 0x30f   : > { %v888_v3 = vmax.f32 %v854_v0, 0.0  ;;  %v907_v0 = vld [vmem:[%s2513_s13 + $0x60] sm:$0xff] }
 0x311   : > { %1799 = vmatmul.mubr.f32.gmra.mrb[70].mxu1 %v888_v3  ;;  %v909_v3 = vld [vmem:[%s2513_s13 + $0x70] sm:$0xff] }
 0x36c   : > { %v1755_v5 = vpop.f32.mrb[32].mxu0 }
 0x36d   : > { %v1009_v6 = vpop.f32.mrb[33].mxu0 }
 0x36e   : > { %v1915_v7 = vpack.c.bf16 %v1755_v5, %v1009_v6  ;;  %v911_v5 = vld [vmem:[%s2513_s13 + $0x80] sm:$0xff]  ;;  %v914_v6 = vld [vmem:[%s2513_s13 + $0x98] sm:$0xff] }
 0x374   : > { %v1758_v8 = vpop.f32.mrb[34].mxu0 }
 0x375   : > { %v1019_v9 = vpop.f32.mrb[35].mxu0 }
 0x376   : > { %v1919_v10 = vpack.c.bf16 %v1758_v8, %v1019_v9  ;;  %v916_v8 = vld [vmem:[%s2513_s13 + $0xa8] sm:$0xff]  ;;  %v915_v9 = vld [vmem:[%s2513_s13 + $0xa0] sm:$0xff] }
 0x37c   : > { %v1761_v11 = vpop.f32.mrb[36].mxu0 }
 0x37d   : > { %v1029_v1 = vpop.f32.mrb[37].mxu0 }
 0x37e   : > { %v1923_v12 = vpack.c.bf16 %v1761_v11, %v1029_v1  ;;  %v917_v11 = vld [vmem:[%s2513_s13 + $0xb0] sm:$0xff]  ;;  %v920_v1 = vld [vmem:[%s2513_s13 + $0xc8] sm:$0xff] }
 0x384   : > { %v1764_v13 = vpop.f32.mrb[38].mxu0 }
 0x385   : > { %v1039_v14 = vpop.f32.mrb[39].mxu0 }
 0x386   : > { %v1927_v15 = vpack.c.bf16 %v1764_v13, %v1039_v14  ;;  %v922_v13 = vld [vmem:[%s2513_s13 + $0xd8] sm:$0xff]  ;;  %v921_v14 = vld [vmem:[%s2513_s13 + $0xd0] sm:$0xff] }
 0x38c   : > { %v1767_v16 = vpop.f32.mrb[40].mxu0 }
 0x38d   : > { %v1049_v17 = vpop.f32.mrb[41].mxu0 }
 0x38e   : > { %v1931_v18 = vpack.c.bf16 %v1767_v16, %v1049_v17  ;;  %v923_v16 = vld [vmem:[%s2513_s13 + $0xe0] sm:$0xff]  ;;  %v926_v17 = vld [vmem:[%s2513_s13 + $0xf8] sm:$0xff] }
 0x394   : > { %v1770_v19 = vpop.f32.mrb[42].mxu0 }
 0x395   : > { %v1059_v20 = vpop.f32.mrb[43].mxu0 }
 0x396   : > { %v1935_v21 = vpack.c.bf16 %v1770_v19, %v1059_v20  ;;  %v2553_v20 = vld [vmem:[%s2646_s5] ss:$0 sm:$0xff] }
 0x39c   : > { %v1773_v22 = vpop.f32.mrb[44].mxu0 }
 0x39d   : > { %v1069_v23 = vpop.f32.mrb[45].mxu0 }
 0x39e   : > { %v1939_v24 = vpack.c.bf16 %v1773_v22, %v1069_v23 }
 0x3a4   : > { %v1776_v25 = vpop.f32.mrb[46].mxu0 }
 0x3a5   : > { %v1079_v26 = vpop.f32.mrb[47].mxu0 }
 0x3a6   : > { %v1943_v27 = vpack.c.bf16 %v1776_v25, %v1079_v26 }
 0x3ac   : > { %v1779_v28 = vpop.f32.mrb[48].mxu0 }
 0x3ad   : > { %v1089_v29 = vpop.f32.mrb[49].mxu0 }
 0x3ae   : > { %v1913_v30 = vpack.c.bf16 %v1779_v28, %v1089_v29 }
 0x3b0   : > { %1914 = vmatprep.subr.bf16.mxu0 %v1913_v30 }
 0x3b1   : > { %1916 = vmatpush3.bf16.msra.mxu0 %v1915_v7  ;;  %v913_v7 = vld [vmem:[%s2513_s13 + $0x90] sm:$0xff] }
 0x3b4   : > { %v1782_v31 = vpop.f32.mrb[50].mxu0 }
 0x3b5   : > { %v1099_v32 = vpop.f32.mrb[51].mxu0 }
 0x3b6   : > { %v1917_v33 = vpack.c.bf16 %v1782_v31, %v1099_v32 }
 0x3b8   : > { %1918 = vmatprep.subr.bf16.mxu0 %v1917_v33 }
 0x3b9   : > { %1920 = vmatpush3.bf16.msra.mxu0 %v1919_v10  ;;  %v918_v10 = vld [vmem:[%s2513_s13 + $0xb8] sm:$0xff] }
 0x3bc   : > { %v1785_v34 = vpop.f32.mrb[52].mxu0 }
 0x3bd   : > { %v1109_v35 = vpop.f32.mrb[53].mxu0 }
 0x3be   : > { %v1921_v36 = vpack.c.bf16 %v1785_v34, %v1109_v35 }
 0x3c0   : > { %1922 = vmatprep.subr.bf16.mxu0 %v1921_v36 }
 0x3c1   : > { %1924 = vmatpush3.bf16.msra.mxu0 %v1923_v12  ;;  %v919_v12 = vld [vmem:[%s2513_s13 + $0xc0] sm:$0xff] }
 0x3c4   : > { %v1788_v37 = vpop.f32.mrb[54].mxu0 }
 0x3c5   : > { %v1119_v38 = vpop.f32.mrb[55].mxu0 }
 0x3c6   : > { %v1925_v39 = vpack.c.bf16 %v1788_v37, %v1119_v38 }
 0x3c8   : > { %1926 = vmatprep.subr.bf16.mxu0 %v1925_v39 }
 0x3c9   : > { %1928 = vmatpush3.bf16.msra.mxu0 %v1927_v15  ;;  %v924_v15 = vld [vmem:[%s2513_s13 + $0xe8] sm:$0xff] }
 0x3cc   : > { %v1791_v40 = vpop.f32.mrb[64].mxu1 }
 0x3cd   : > { %v1129_v41 = vpop.f32.mrb[65].mxu1 }
 0x3ce   : > { %v1929_v42 = vpack.c.bf16 %v1791_v40, %v1129_v41 }
 0x3d0   : > { %1930 = vmatprep.subr.bf16.mxu0 %v1929_v42 }
 0x3d1   : > { %1932 = vmatpush3.bf16.msra.mxu0 %v1931_v18  ;;  %v925_v18 = vld [vmem:[%s2513_s13 + $0xf0] sm:$0xff] }
 0x3d4   : > { %v1794_v43 = vpop.f32.mrb[66].mxu1 }
 0x3d5   : > { %v1139_v44 = vpop.f32.mrb[67].mxu1 }
 0x3d6   : > { %v1933_v45 = vpack.c.bf16 %v1794_v43, %v1139_v44 }
 0x3d8   : > { %1934 = vmatprep.subr.bf16.mxu0 %v1933_v45 }
 0x3d9   : > { %1936 = vmatpush3.bf16.msra.mxu0 %v1935_v21 }
 0x3dc   : > { %v1797_v46 = vpop.f32.mrb[68].mxu1 }
 0x3dd   : > { %v1149_v47 = vpop.f32.mrb[69].mxu1 }
 0x3de   : > { %v1937_v48 = vpack.c.bf16 %v1797_v46, %v1149_v47 }
 0x3e0   : > { %1938 = vmatprep.subr.bf16.mxu0 %v1937_v48 }
 0x3e1   : > { %1940 = vmatpush3.bf16.msra.mxu0 %v1939_v24 }
 0x3e4   : > { %v1800_v49 = vpop.f32.mrb[70].mxu1 }
 0x3e5   : > { %v1159_v50 = vpop.f32.mrb[71].mxu1 }
 0x3e6   : > { %v1941_v51 = vpack.c.bf16 %v1800_v49, %v1159_v50 }
 0x3e8   : > { %1942 = vmatprep.subr.bf16.mxu0 %v1941_v51 }
 0x3e9   : > { %1944 = vmatpush3.bf16.msra.mxu0 %v1943_v27 }
 0x3ec   : > { %1238 = vmatmul.mubr.f32.vlgmr.msra.gmra.mrb[56].mxu0 %v895_v52 }
 0x3ed   : > { %1242 = vmatprep.mubr.f32.mxu0 %v898_v53 }
 0x3f0   : > { %1243 = vmatmul.mubr.f32.gmra.mrb[58].mxu0 %v897_v54 }
 0x3f1   : > { %1247 = vmatprep.mubr.f32.mxu0 %v900_v55 }
 0x3f4   : > { %1248 = vmatmul.mubr.f32.gmra.mrb[60].mxu0 %v899_v56 }
 0x3f5   : > { %1252 = vmatprep.mubr.f32.mxu0 %v902_v57 }
 0x3f8   : > { %1253 = vmatmul.mubr.f32.gmra.mrb[62].mxu0 %v901_v58 }
 0x3f9   : > { %1257 = vmatprep.mubr.f32.mxu0 %v904_v59 }
 0x3fc   : > { %1258 = vmatmul.mubr.f32.gmra.mrb[64].mxu0 %v903_v60 }
 0x3fd   : > { %1262 = vmatprep.mubr.f32.mxu0 %v906_v61 }
 0x400   : > { %1263 = vmatmul.mubr.f32.gmra.mrb[66].mxu0 %v905_v62 }
 0x401   : > { %1267 = vmatprep.mubr.f32.mxu0 %v908_v63 }
 0x404   : > { %1268 = vmatmul.mubr.f32.gmra.mrb[68].mxu0 %v907_v0 }
 0x405   : > { %1272 = vmatprep.mubr.f32.mxu0 %v910_v2 }
 0x408   : > { %1273 = vmatmul.mubr.f32.gmra.mrb[70].mxu0 %v909_v3 }
 0x409   : > { %1277 = vmatprep.mubr.f32.mxu0 %v912_v4 }
 0x40c   : > { %1278 = vmatmul.mubr.f32.gmra.mrb[72].mxu0 %v911_v5 }
 0x40d   : > { %1282 = vmatprep.mubr.f32.mxu0 %v914_v6 }
 0x410   : > { %1283 = vmatmul.mubr.f32.gmra.mrb[74].mxu0 %v913_v7 }
 0x411   : > { %1287 = vmatprep.mubr.f32.mxu0 %v916_v8 }
 0x414   : > { %1288 = vmatmul.mubr.f32.gmra.mrb[76].mxu0 %v915_v9 }
 0x415   : > { %1292 = vmatprep.mubr.f32.mxu0 %v918_v10 }
 0x418   : > { %1293 = vmatmul.mubr.f32.gmra.mrb[78].mxu0 %v917_v11 }
 0x419   : > { %1297 = vmatprep.mubr.f32.mxu0 %v920_v1 }
 0x41c   : > { %1298 = vmatmul.mubr.f32.gmra.mrb[80].mxu0 %v919_v12 }
 0x41d   : > { %1302 = vmatprep.mubr.f32.mxu0 %v922_v13 }
 0x420   : > { %1303 = vmatmul.mubr.f32.gmra.mrb[82].mxu0 %v921_v14 }
 0x421   : > { %1307 = vmatprep.mubr.f32.mxu0 %v924_v15 }
 0x424   : > { %1308 = vmatmul.mubr.f32.gmra.mrb[84].mxu0 %v923_v16 }
 0x425   : > { %1312 = vmatprep.mubr.f32.mxu0 %v926_v17 }
 0x428   : > { %1313 = vmatmul.mubr.f32.gmra.mrb[86].mxu0 %v925_v18 }
 0x4bf   : > { %v1593_v19 = vpop.f32.mrb[56].mxu0 }
 0x4c0   : > { %v1594_v21 = vpop.f32.mrb[57].mxu0 }
 0x4c1   : > { %v1595_v22 = vadd.f32 %v1594_v21, %v1593_v19 }
 0x4c3   : > { %v1240_v23 = vadd.f32 %v1595_v22, %v2553_v20  ;;  %v1596_v24 = vpop.f32.mrb[58].mxu0 }
 0x4c4   : > { %v1597_v25 = vpop.f32.mrb[59].mxu0 }
 0x4c5   : > { %1318 = vst [vmem:[%s2556_s29] sm:$0xff] %v1240_v23  ;;  %v1598_v26 = vadd.f32 %v1597_v25, %v1596_v24 }
 0x4c7   : > { %v1245_v27 = vadd.f32 %v1598_v26, %v2553_v20  ;;  %v1599_v28 = vpop.f32.mrb[60].mxu0 }
 0x4c8   : > { %v1600_v29 = vpop.f32.mrb[61].mxu0 }
 0x4c9   : > { %1319 = vst [vmem:[%s2556_s29 + $0x8] sm:$0xff] %v1245_v27  ;;  %v1601_v30 = vadd.f32 %v1600_v29, %v1599_v28 }
 0x4cb   : > { %v1250_v31 = vadd.f32 %v1601_v30, %v2553_v20  ;;  %v1602_v32 = vpop.f32.mrb[62].mxu0 }
 0x4cc   : > { %v1603_v33 = vpop.f32.mrb[63].mxu0 }
 0x4cd   : > { %1320 = vst [vmem:[%s2556_s29 + $0x10] sm:$0xff] %v1250_v31  ;;  %v1604_v34 = vadd.f32 %v1603_v33, %v1602_v32 }
 0x4cf   : > { %v1255_v35 = vadd.f32 %v1604_v34, %v2553_v20  ;;  %v1605_v36 = vpop.f32.mrb[64].mxu0 }
 0x4d0   : > { %v1606_v37 = vpop.f32.mrb[65].mxu0 }
 0x4d1   : > { %1321 = vst [vmem:[%s2556_s29 + $0x18] sm:$0xff] %v1255_v35  ;;  %v1607_v38 = vadd.f32 %v1606_v37, %v1605_v36 }
 0x4d3   : > { %v1260_v39 = vadd.f32 %v1607_v38, %v2553_v20  ;;  %v1608_v40 = vpop.f32.mrb[66].mxu0 }
 0x4d4   : > { %v1609_v41 = vpop.f32.mrb[67].mxu0 }
 0x4d5   : > { %1322 = vst [vmem:[%s2556_s29 + $0x20] sm:$0xff] %v1260_v39  ;;  %v1610_v42 = vadd.f32 %v1609_v41, %v1608_v40 }
 0x4d7   : > { %v1265_v43 = vadd.f32 %v1610_v42, %v2553_v20  ;;  %v1611_v44 = vpop.f32.mrb[68].mxu0 }
 0x4d8   : > { %v1612_v45 = vpop.f32.mrb[69].mxu0 }
 0x4d9   : > { %1323 = vst [vmem:[%s2556_s29 + $0x28] sm:$0xff] %v1265_v43  ;;  %v1613_v46 = vadd.f32 %v1612_v45, %v1611_v44 }
 0x4db   : > { %v1270_v47 = vadd.f32 %v1613_v46, %v2553_v20  ;;  %v1614_v48 = vpop.f32.mrb[70].mxu0 }
 0x4dc   : > { %v1615_v49 = vpop.f32.mrb[71].mxu0 }
 0x4dd   : > { %1324 = vst [vmem:[%s2556_s29 + $0x30] sm:$0xff] %v1270_v47  ;;  %v1616_v50 = vadd.f32 %v1615_v49, %v1614_v48 }
 0x4df   : > { %v1275_v51 = vadd.f32 %v1616_v50, %v2553_v20  ;;  %v1617_v52 = vpop.f32.mrb[72].mxu0 }
 0x4e0   : > { %v1618_v53 = vpop.f32.mrb[73].mxu0 }
 0x4e1   : > { %1325 = vst [vmem:[%s2556_s29 + $0x38] sm:$0xff] %v1275_v51  ;;  %v1619_v54 = vadd.f32 %v1618_v53, %v1617_v52 }
 0x4e3   : > { %v1280_v55 = vadd.f32 %v1619_v54, %v2553_v20  ;;  %v1620_v56 = vpop.f32.mrb[74].mxu0 }
 0x4e4   : > { %v1621_v57 = vpop.f32.mrb[75].mxu0 }
 0x4e5   : > { %1326 = vst [vmem:[%s2556_s29 + $0x40] sm:$0xff] %v1280_v55  ;;  %v1622_v58 = vadd.f32 %v1621_v57, %v1620_v56 }
 0x4e7   : > { %v1285_v59 = vadd.f32 %v1622_v58, %v2553_v20  ;;  %v1623_v60 = vpop.f32.mrb[76].mxu0 }
 0x4e8   : > { %v1624_v61 = vpop.f32.mrb[77].mxu0 }
 0x4e9   : > { %1327 = vst [vmem:[%s2556_s29 + $0x48] sm:$0xff] %v1285_v59  ;;  %v1625_v62 = vadd.f32 %v1624_v61, %v1623_v60 }
 0x4eb   : > { %v1290_v63 = vadd.f32 %v1625_v62, %v2553_v20  ;;  %v1626_v0 = vpop.f32.mrb[78].mxu0 }
 0x4ec   : > { %v1627_v2 = vpop.f32.mrb[79].mxu0 }
 0x4ed   : > { %1328 = vst [vmem:[%s2556_s29 + $0x50] sm:$0xff] %v1290_v63  ;;  %v1628_v3 = vadd.f32 %v1627_v2, %v1626_v0 }
 0x4ef   : > { %v1295_v4 = vadd.f32 %v1628_v3, %v2553_v20  ;;  %v1629_v5 = vpop.f32.mrb[80].mxu0 }
 0x4f0   : > { %v1630_v6 = vpop.f32.mrb[81].mxu0 }
 0x4f1   : > { %1329 = vst [vmem:[%s2556_s29 + $0x58] sm:$0xff] %v1295_v4  ;;  %v1631_v7 = vadd.f32 %v1630_v6, %v1629_v5 }
 0x4f3   : > { %v1300_v8 = vadd.f32 %v1631_v7, %v2553_v20  ;;  %v1632_v9 = vpop.f32.mrb[82].mxu0 }
 0x4f4   : > { %v1633_v10 = vpop.f32.mrb[83].mxu0 }
 0x4f5   : > { %1330 = vst [vmem:[%s2556_s29 + $0x60] sm:$0xff] %v1300_v8  ;;  %v1634_v11 = vadd.f32 %v1633_v10, %v1632_v9 }
 0x4f7   : > { %v1305_v1 = vadd.f32 %v1634_v11, %v2553_v20  ;;  %v1635_v12 = vpop.f32.mrb[84].mxu0 }
 0x4f8   : > { %v1636_v13 = vpop.f32.mrb[85].mxu0 }
 0x4f9   : > { %1331 = vst [vmem:[%s2556_s29 + $0x68] sm:$0xff] %v1305_v1  ;;  %v1637_v14 = vadd.f32 %v1636_v13, %v1635_v12 }
 0x4fb   : > { %v1310_v15 = vadd.f32 %v1637_v14, %v2553_v20  ;;  %v1638_v16 = vpop.f32.mrb[86].mxu0 }
 0x4fc   : > { %v1639_v17 = vpop.f32.mrb[87].mxu0 }
 0x4fd   : > { %1332 = vst [vmem:[%s2556_s29 + $0x70] sm:$0xff] %v1310_v15  ;;  %v1640_v18 = vadd.f32 %v1639_v17, %v1638_v16 }
 0x4ff   : > { %v1315_v19 = vadd.f32 %v1640_v18, %v2553_v20 }
 0x501   : > { %1333 = vst [vmem:[%s2556_s29 + $0x78] sm:$0xff] %v1315_v19 }
 0x502   : > { %2173 = shalt.err (!%p2170_p5)
}
 0x503   : > { %s2174_s28 = scalar_lea.hbm %s2592_s15, 2048  ;;  %s2178_s10 = scalar_lea.hbm %s2647_s6, 4096 }
 0x504   : > { %p2175_p0 = scmp.ne.s32.totalorder %s2592_s15, %s2174_s28  ;;  %p2179_p10 = scmp.lt.u32.totalorder %s2592_s15, %s2647_s6 }
 0x505   : > { %p2180_p13 = scmp.lt.u32.totalorder %s2178_s10, %s2174_s28  ;;  %p2182_p1 = scmp.lt.u32.totalorder %s2174_s28, %s2592_s15 }
 0x506   : > { %p2176_p6 = pnand %p2175_p0, %p2672_p2 }
 0x507   : > { %p2181_p12 = por %p2180_p13, %p2179_p10 }
 0x508   : > { %p2177_p9 = pneg %p2176_p6 }
 0x509   : > { %p2183_p3 = por %p2182_p1, %p2181_p12 }
 0x50b   : > { %p2184_p4 = pnand %p2183_p3, %p2177_p9 }
 0x50d   : > { %2187 = shalt.err (!%p2184_p4)
}
 0x50e   : > { %s2246_s26 = smov 128   ;;  %s2247_s29 = smov 8  }
 0x50f   : > { %1977 = dma.vmem_to_hbm [thread:$0]  (%p2672_p2), %s2594_s16, 2048, %s2592_s15, %s2600_s30, %s2246_s26, %s2246_s26, %s2247_s29  }
 0x510 PF: > { %p2004_p7 = scmp.ge.s32.totalorder %s2234_s24, 2  ;;  %s1363_s11 = sand.u32 1, %s2222_s21  }
 0x511   : > { %p2673_p8 = scmp.ne.s32.totalorder %s2658_s8, 0  ;;  %s1364_s14 = scalar_lea.sflag [#allocation4], %s1363_s11 }
 0x513   : > { %p1993_p11 = pnand %p2004_p7, %p2673_p8 }
 0x515   : > { %2217 = dma.done.wait (!%p1993_p11), %s1364_s14, 2048  }
 0x516   : > { %2219 = vsyncadd (!%p1993_p11), %s1364_s14, 4294965248  ;;  %s2674_s19 = sld [smem:[#allocation15_spill]]  ;;  %p19_p5 = scmp.ge.s32.totalorder %s2308_s27, 4  }
 0x517   : > { %s2675_s21 = smov %s2226_s22  ;;  %s2676_s22 = smov %s2230_s23 }
 0x518   : > { %s2678_s24 = smov %s2308_s27  ;;  %21 = sbr.rel (!%p19_p5) target bundleno = 8 (0x8), region = 94 }
 0x51c   : > { %s2677_s23 = smov %s2674_s19 }
 0x51f   :  { %1369 = vsyncpa [#allocation3], 1 }
 0x520   :  { %1371 = vsyncpa [#allocation3 + $0x1], 1 }
 0x521   :  { %1372 = vsyncpa [#allocation6], 1 }
 0x522   :  { %1373 = vsyncpa [#allocation9], 1 }
 0x523   :  { %1374 = vsyncpa [#allocation4], 1 }
 0x524   :  { %1376 = vsyncpa [#allocation4 + $0x1], 1 }

</bundles_post_ra>
